<compile_context>
chip_gen: v5e
topology: v5e:2x2
jax: 0.10.0
libtpu: 0.0.40
codegen_flags: <defaults>
</compile_context>

<pallas_src>
import functools
import math

import jax
import jax.numpy as jnp
from jax.experimental import pallas as pl
from jax.experimental.pallas import tpu as pltpu


# ----------------------------------------------------------------------------
# Helpers
# ----------------------------------------------------------------------------
def _round_up(v, m):
    return ((v + m - 1) // m) * m


def _choose_tile(dim, pref, align):
    """Largest tile <= pref dividing dim and a multiple of align, else full dim."""
    t = pref
    while t >= align:
        if dim % t == 0:
            return t
        t //= 2
    return dim


@functools.lru_cache(maxsize=1)
def _vmem_limit():
    """Generation-specific VMEM cap: ~96 MiB on v5e/v6e, ~48 MiB on v7x."""
    try:
        cap = pltpu.get_tpu_info().vmem_capacity_bytes
        return min(int(cap * 3 // 4), 100 * 1024 * 1024)
    except Exception:
        return 48 * 1024 * 1024  # conservative fallback (safe on every gen)


# ----------------------------------------------------------------------------
# Fused rmsnorm + linear (+gelu) (+residual) kernel
# ----------------------------------------------------------------------------
def _make_fused_linear_kernel(*, has_norm, has_bias, has_residual, activation,
                              rms_eps, rms_dim):
    inv_sqrt_d = rms_dim ** (-0.5)

    def kernel(*refs):
        it = iter(refs)
        x_ref = next(it)
        g_ref = next(it) if has_norm else None
        w_ref = next(it)
        b_ref = next(it) if has_bias else None
        r_ref = next(it) if has_residual else None
        o_ref = next(it)
        xn_ref = next(it) if has_norm else None   # (tm, K) bf16 VMEM scratch

        if has_norm:
            # Compute RMSNorm + bf16 cast ONCE per M-tile (j == 0), reuse for
            # every N-tile from the VMEM scratch.  N axis is "arbitrary".
            @pl.when(pl.program_id(1) == 0)
            def _():
                xf = x_ref[...].astype(jnp.float32)
                # Reference RMSNorm: x / (||x|| * d^-0.5 + eps) * gamma
                rms = jnp.sqrt(jnp.sum(xf * xf, axis=-1, keepdims=True)) * inv_sqrt_d
                xn_ref[...] = (g_ref[...].astype(jnp.float32)
                               * (xf / (rms + rms_eps))).astype(jnp.bfloat16)
            xm = xn_ref[...]
        else:
            xm = x_ref[...].astype(jnp.bfloat16)

        # bf16 x bf16 -> f32 accumulation on the MXU.
        y = jnp.dot(xm, w_ref[...], preferred_element_type=jnp.float32)

        if has_bias:
            y = y + b_ref[...].astype(jnp.float32)
        if activation == "gelu_tanh":
            # GELU(approximate='tanh')
            c = 0.7978845608028654
            y = 0.5 * y * (1.0 + jnp.tanh(c * (y + 0.044715 * (y * y * y))))
        if has_residual:
            y = y + r_ref[...].astype(jnp.float32)
        o_ref[...] = y.astype(o_ref.dtype)

    return kernel


def fused_linear(x2d, w, *, gamma=None, bias=None, residual=None,
                 activation=None, rms_eps=1e-5, out_dtype=jnp.float32,
                 tm_pref=256, tn_pref=256):
    """out = [residual +] act([rmsnorm(x) | x] @ w [+ bias]).

    x2d: (M, K); w: (K, N) bf16; gamma: (K,) f32; bias: (N,) f32;
    residual: (M, N) -> (M, N) out_dtype.
    """
    M, K = x2d.shape
    Kw, N = w.shape
    assert K == Kw
    tm = _choose_tile(M, tm_pref, 8)
    tn = _choose_tile(N, tn_pref, 128)

    has_norm = gamma is not None
    has_bias = bias is not None
    has_res = residual is not None

    inputs = [x2d]
    in_specs = [pl.BlockSpec((tm, K), lambda i, j: (i, 0))]
    if has_norm:
        inputs.append(gamma.reshape(1, K))
        in_specs.append(pl.BlockSpec((1, K), lambda i, j: (0, 0)))
    inputs.append(w)
    in_specs.append(pl.BlockSpec((K, tn), lambda i, j: (0, j)))
    if has_bias:
        inputs.append(bias.reshape(1, N))
        in_specs.append(pl.BlockSpec((1, tn), lambda i, j: (0, j)))
    if has_res:
        inputs.append(residual)
        in_specs.append(pl.BlockSpec((tm, tn), lambda i, j: (i, j)))

    kernel = _make_fused_linear_kernel(
        has_norm=has_norm, has_bias=has_bias, has_residual=has_res,
        activation=activation, rms_eps=rms_eps, rms_dim=K)

    scratch_shapes = [pltpu.VMEM((tm, K), jnp.bfloat16)] if has_norm else []

    return pl.pallas_call(
        kernel,
        out_shape=jax.ShapeDtypeStruct((M, N), out_dtype),
        grid=(M // tm, N // tn),
        in_specs=in_specs,
        out_specs=pl.BlockSpec((tm, tn), lambda i, j: (i, j)),
        scratch_shapes=scratch_shapes,
        compiler_params=pltpu.CompilerParams(
            # N axis must be sequential so the normalized-x scratch (filled at
            # j == 0) is valid for the following j's of the same M-tile.
            dimension_semantics=("parallel", "arbitrary"),
            vmem_limit_bytes=_vmem_limit()),
    )(*inputs)


# ----------------------------------------------------------------------------
# Causal self-attention with rotary embeddings (one head per grid step)
# ----------------------------------------------------------------------------
def _attn_head_kernel(q_ref, k_ref, v_ref, cos_ref, sin_ref, o_ref, *,
                      head_dim, scale):
    # q/k/v/o blocks: (1, 1, T, hd); cos/sin: (T, hd)
    q = q_ref[0, 0].astype(jnp.float32)
    k = k_ref[0, 0].astype(jnp.float32)
    v = v_ref[0, 0].astype(jnp.bfloat16)
    cos = cos_ref[...]
    sin = sin_ref[...]
    T = q.shape[0]
    half = head_dim // 2

    def rot_half(x):
        # matches the reference rotate_half (half-split convention)
        return jnp.concatenate([-x[:, half:], x[:, :half]], axis=-1)

    # rotary embeddings (f32); 1/sqrt(hd) scale folded into q (cheaper on (T,hd))
    q = q * cos + rot_half(q) * sin
    k = k * cos + rot_half(k) * sin
    q = q * scale

    # q @ k^T (contract last dims) in bf16, f32 accumulation
    s = jax.lax.dot_general(
        q.astype(jnp.bfloat16), k.astype(jnp.bfloat16),
        (((1,), (1,)), ((), ())), preferred_element_type=jnp.float32)

    row = jax.lax.broadcasted_iota(jnp.int32, (T, T), 0)
    col = jax.lax.broadcasted_iota(jnp.int32, (T, T), 1)
    s = jnp.where(col <= row, s, -jnp.inf)
    s = s - jnp.max(s, axis=-1, keepdims=True)
    p = jnp.exp(s)
    p = p / jnp.sum(p, axis=-1, keepdims=True)

    o_ref[0, 0] = jnp.dot(p.astype(jnp.bfloat16), v,
                          preferred_element_type=jnp.float32).astype(o_ref.dtype)


def causal_attention(qkv, cos, sin, *, n_head):
    """qkv: (B, T, 3C) -> (B, T, C) bf16 attention output (heads merged)."""
    B, T, threeC = qkv.shape
    C = threeC // 3
    hd = C // n_head
    scale = 1.0 / math.sqrt(hd)

    # Head-major layout plumbing (XLA side): (B, T, 3, n_head, hd)
    qkv_h = qkv.reshape(B, T, 3, n_head, hd)
    q = jnp.transpose(qkv_h[:, :, 0], (0, 2, 1, 3))  # (B, n_head, T, hd)
    k = jnp.transpose(qkv_h[:, :, 1], (0, 2, 1, 3))
    v = jnp.transpose(qkv_h[:, :, 2], (0, 2, 1, 3))

    kernel = functools.partial(_attn_head_kernel, head_dim=hd, scale=scale)
    out = pl.pallas_call(
        kernel,
        out_shape=jax.ShapeDtypeStruct((B, n_head, T, hd), jnp.bfloat16),
        grid=(B, n_head),
        in_specs=[
            pl.BlockSpec((1, 1, T, hd), lambda b, h: (b, h, 0, 0)),
            pl.BlockSpec((1, 1, T, hd), lambda b, h: (b, h, 0, 0)),
            pl.BlockSpec((1, 1, T, hd), lambda b, h: (b, h, 0, 0)),
            pl.BlockSpec((T, hd), lambda b, h: (0, 0)),
            pl.BlockSpec((T, hd), lambda b, h: (0, 0)),
        ],
        out_specs=pl.BlockSpec((1, 1, T, hd), lambda b, h: (b, h, 0, 0)),
        compiler_params=pltpu.CompilerParams(
            dimension_semantics=("parallel", "parallel"),
            vmem_limit_bytes=_vmem_limit()),
    )(q, k, v, cos, sin)

    # merge heads back to (B, T, C) — matches y.transpose(1,2).view(B,T,C)
    return jnp.transpose(out, (0, 2, 1, 3)).reshape(B, T, C)


# ----------------------------------------------------------------------------
# Model definition (parameters + forward)
# ----------------------------------------------------------------------------
def precompute_theta_freqs(dim, context_length):
    assert dim % 2 == 0
    thetas = 1.0 / (10000.0 ** (jnp.arange(0, dim, 2, dtype=jnp.float32) / dim))
    m = jnp.arange(context_length, dtype=jnp.float32)
    m_theta = jnp.outer(m, thetas)
    cos_freqs = jnp.repeat(jnp.cos(m_theta), 2, axis=-1)
    sin_freqs = jnp.repeat(jnp.sin(m_theta), 2, axis=-1)
    return cos_freqs, sin_freqs


def init_params(key, *, vocab_size, block_size, n_layer, n_head, n_embed):
    std = 0.02
    std_res = 0.02 + (2 * n_layer) ** (-0.5)
    C = n_embed
    v_pad = _round_up(vocab_size, 256)

    keys = jax.random.split(key, 2 + 5 * n_layer)   # 5 weight keys per layer
    ki = iter(keys)

    lm_head = jax.random.normal(next(ki), (C, vocab_size), jnp.float32) * std
    lm_head = jnp.pad(lm_head, ((0, 0), (0, v_pad - vocab_size)))

    params = {
        "wte": jax.random.normal(next(ki), (vocab_size, C), jnp.float32) * std,
        "ln_f_g": jnp.ones((C,), jnp.float32),
        "lm_head_w": lm_head.astype(jnp.bfloat16),
        "vocab_size": vocab_size,
        "layers": [],
    }
    for _ in range(n_layer):
        w_qk = jax.random.normal(next(ki), (C, 2 * C), jnp.float32) * std
        w_v = jax.random.normal(next(ki), (C, C), jnp.float32) * std
        layer = {
            "ln1_g": jnp.ones((C,), jnp.float32),
            # merged QKV projection: columns [q | k | v]
            "w_qkv": jnp.concatenate([w_qk, w_v], axis=1).astype(jnp.bfloat16),
            "b_qkv": jnp.zeros((3 * C,), jnp.float32),
            "w_attn_proj": (jax.random.normal(next(ki), (C, C), jnp.float32)
                            * std_res).astype(jnp.bfloat16),
            "b_attn_proj": jnp.zeros((C,), jnp.float32),
            "ln2_g": jnp.ones((C,), jnp.float32),
            "w_fc": (jax.random.normal(next(ki), (C, 4 * C), jnp.float32)
                     * std).astype(jnp.bfloat16),
            "b_fc": jnp.zeros((4 * C,), jnp.float32),
            "w_mlp_proj": (jax.random.normal(next(ki), (4 * C, C), jnp.float32)
                           * std_res).astype(jnp.bfloat16),
            "b_mlp_proj": jnp.zeros((C,), jnp.float32),
        }
        params["layers"].append(layer)
    return params


def gpt2_forward(params, idx, *, n_head, cos_freqs, sin_freqs, vocab_size):
    """idx: (B, T) int32 token ids -> logits (B, T, vocab)."""
    B, T = idx.shape
    C = params["wte"].shape[1]
    M = B * T

    # token embedding gather (XLA glue; use_rotary=True so no wpe added)
    x = jnp.take(params["wte"], idx, axis=0).reshape(M, C)  # f32 residual stream
    # TODO(synk): a bf16 residual stream would halve residual HBM traffic if
    # the accuracy budget allows; kept f32 here to stay close to the reference.

    cos = cos_freqs[:T]
    sin = sin_freqs[:T]

    for layer in params["layers"]:
        # --- attention block: rmsnorm fused into QKV projection ---
        qkv = fused_linear(x, layer["w_qkv"], gamma=layer["ln1_g"],
                           bias=layer["b_qkv"], out_dtype=jnp.bfloat16)  # (M,3C)
        y = causal_attention(qkv.reshape(B, T, 3 * C), cos, sin,
                             n_head=n_head)                               # (B,T,C)
        # attn out-proj with residual add fused into the epilogue
        x = fused_linear(y.reshape(M, C), layer["w_attn_proj"],
                         bias=layer["b_attn_proj"], residual=x,
                         out_dtype=jnp.float32)

        # --- MLP block: rmsnorm fused into c_fc, residual fused into c_proj ---
        h = fused_linear(x, layer["w_fc"], gamma=layer["ln2_g"],
                         bias=layer["b_fc"], activation="gelu_tanh",
                         out_dtype=jnp.bfloat16)                          # (M,4C)
        x = fused_linear(h, layer["w_mlp_proj"], bias=layer["b_mlp_proj"],
                         residual=x, out_dtype=jnp.float32)

    # final rmsnorm fused into the (bias-free, vocab-padded) lm head;
    # large tm so the big weight is re-streamed from HBM fewer times.
    logits = fused_linear(x, params["lm_head_w"], gamma=params["ln_f_g"],
                          out_dtype=jnp.float32, tm_pref=512)
    v_pad = params["lm_head_w"].shape[1]
    if v_pad != vocab_size:                      # slice only when padded
        logits = logits[:, :vocab_size]
    return logits.reshape(B, T, vocab_size)


if __name__ == "__main__":
    # Small GPTConfig-consistent shapes
    vocab_size = 256
    block_size = 64
    n_layer = 2
    n_head = 4
    n_embed = 64
    head_dim = n_embed // n_head
    B, T = 2, 16

    key = jax.random.PRNGKey(0)
    k_param, k_idx = jax.random.split(key)
    params = init_params(
        k_param,
        vocab_size=vocab_size,
        block_size=block_size,
        n_layer=n_layer,
        n_head=n_head,
        n_embed=n_embed,
    )
    cos_freqs, sin_freqs = precompute_theta_freqs(head_dim, block_size)

    idx = jax.random.randint(k_idx, (B, T), 0, vocab_size, dtype=jnp.int32)

    fwd = jax.jit(
        functools.partial(
            gpt2_forward, n_head=n_head, cos_freqs=cos_freqs,
            sin_freqs=sin_freqs, vocab_size=vocab_size,
        )
    )
    logits = fwd(params, idx)
    jax.block_until_ready(logits)
    assert logits.shape == (B, T, vocab_size)
    assert bool(jnp.all(jnp.isfinite(logits)))
    print("KERNEL_OK")
</pallas_src>

<mosaic_0001>
module attributes {stable_mosaic.version = 11 : i64} {
  func.func @kernel(%arg0: i32, %arg1: i32, %arg2: memref<32x64xf32, #tpu.memory_space<vmem>>, %arg3: memref<1x64xf32, #tpu.memory_space<vmem>>, %arg4: memref<64x192xbf16, #tpu.memory_space<vmem>>, %arg5: memref<1x192xf32, #tpu.memory_space<vmem>>, %arg6: memref<32x192xbf16, #tpu.memory_space<vmem>>, %arg7: memref<32x64xbf16, #tpu.memory_space<vmem>>) attributes {dimension_semantics = [#tpu.dimension_semantics<parallel>, #tpu.dimension_semantics<arbitrary>], iteration_bounds = array<i64: 1, 1>, scalar_prefetch = 0 : i64, scratch_operands = 1 : i64, tpu.core_type = #tpu.core_type<tc>, window_params = [{transform_indices = @transform_0, window_bounds = array<i64: 32, 64>}, {pipeline_mode = #tpu.pipeline_mode<synchronous>, transform_indices = @transform_1, window_bounds = array<i64: 1, 64>}, {transform_indices = @transform_2, window_bounds = array<i64: 64, 192>}, {transform_indices = @transform_3, window_bounds = array<i64: 1, 192>}, {transform_indices = @transform_4, window_bounds = array<i64: 32, 192>}]} {
    %c0_i32 = arith.constant 0 : i32
    %0 = arith.cmpi eq, %arg1, %c0_i32 : i32
    %1 = arith.extui %0 : i1 to i32
    %c0_i32_0 = arith.constant 0 : i32
    %2 = arith.cmpi ne, %1, %c0_i32_0 : i32
    scf.if %2 {
      %c0_8 = arith.constant 0 : index
      %c0_9 = arith.constant 0 : index
      %11 = vector.load %arg2[%c0_8, %c0_9] : memref<32x64xf32, #tpu.memory_space<vmem>>, vector<32x64xf32>
      %12 = arith.mulf %11, %11 : vector<32x64xf32>
      %cst_10 = arith.constant dense<0.000000e+00> : vector<32xf32>
      %13 = vector.multi_reduction <add>, %12, %cst_10 [1] : vector<32x64xf32> to vector<32xf32>
      %14 = vector.shape_cast %13 : vector<32xf32> to vector<32x1xf32>
      %15 = math.sqrt %14 : vector<32x1xf32>
      %cst_11 = arith.constant 1.250000e-01 : f32
      %16 = vector.broadcast %cst_11 : f32 to vector<32x1xf32>
      %17 = arith.mulf %15, %16 : vector<32x1xf32>
      %c0_12 = arith.constant 0 : index
      %c0_13 = arith.constant 0 : index
      %18 = vector.load %arg3[%c0_12, %c0_13] : memref<1x64xf32, #tpu.memory_space<vmem>>, vector<1x64xf32>
      %cst_14 = arith.constant 9.99999974E-6 : f32
      %19 = vector.broadcast %cst_14 : f32 to vector<32x1xf32>
      %20 = arith.addf %17, %19 : vector<32x1xf32>
      %21 = vector.broadcast %20 : vector<32x1xf32> to vector<32x64xf32>
      %22 = arith.divf %11, %21 : vector<32x64xf32>
      %23 = vector.broadcast %18 : vector<1x64xf32> to vector<32x64xf32>
      %24 = arith.mulf %23, %22 : vector<32x64xf32>
      %25 = arith.truncf %24 : vector<32x64xf32> to vector<32x64xbf16>
      %c0_15 = arith.constant 0 : index
      %c0_16 = arith.constant 0 : index
      %26 = vector.load %arg7[%c0_15, %c0_16] : memref<32x64xbf16, #tpu.memory_space<vmem>>, vector<32x64xbf16>
      tpu.vector_store %arg7[%c0_15, %c0_16], %25 {strides = array<i32>} : memref<32x64xbf16, #tpu.memory_space<vmem>>, vector<32x64xbf16>,
    } else {
    }
    %c0 = arith.constant 0 : index
    %c0_1 = arith.constant 0 : index
    %3 = vector.load %arg7[%c0, %c0_1] : memref<32x64xbf16, #tpu.memory_space<vmem>>, vector<32x64xbf16>
    %c0_2 = arith.constant 0 : index
    %c0_3 = arith.constant 0 : index
    %4 = vector.load %arg4[%c0_2, %c0_3] : memref<64x192xbf16, #tpu.memory_space<vmem>>, vector<64x192xbf16>
    %cst = arith.constant dense<0.000000e+00> : vector<32x192xf32>
    %5 = tpu.matmul %3, %4, %cst {dimension_numbers = #tpu.dot_dimension_numbers<[1], [0], [0], [1], [0, 0, 1, 1], [], []>} : vector<32x64xbf16>, vector<64x192xbf16>, vector<32x192xf32> -> vector<32x192xf32>
    %c0_4 = arith.constant 0 : index
    %c0_5 = arith.constant 0 : index
    %6 = vector.load %arg5[%c0_4, %c0_5] : memref<1x192xf32, #tpu.memory_space<vmem>>, vector<1x192xf32>
    %7 = vector.broadcast %6 : vector<1x192xf32> to vector<32x192xf32>
    %8 = arith.addf %5, %7 : vector<32x192xf32>
    %9 = arith.truncf %8 : vector<32x192xf32> to vector<32x192xbf16>
    %c0_6 = arith.constant 0 : index
    %c0_7 = arith.constant 0 : index
    %10 = vector.load %arg6[%c0_6, %c0_7] : memref<32x192xbf16, #tpu.memory_space<vmem>>, vector<32x192xbf16>
    tpu.vector_store %arg6[%c0_6, %c0_7], %9 {strides = array<i32>} : memref<32x192xbf16, #tpu.memory_space<vmem>>, vector<32x192xbf16>,
    return
  }
  func.func @transform_0(%arg0: i32, %arg1: i32) -> (i32, i32) {
    %c0_i32 = arith.constant 0 : i32
    %c0_i32_0 = arith.constant 0 : i32
    return %arg0, %c0_i32 : i32, i32
  }
  func.func @transform_1(%arg0: i32, %arg1: i32) -> (i32, i32) {
    %c0_i32 = arith.constant 0 : i32
    %c0_i32_0 = arith.constant 0 : i32
    %c0_i32_1 = arith.constant 0 : i32
    return %c0_i32, %c0_i32_0 : i32, i32
  }
  func.func @transform_2(%arg0: i32, %arg1: i32) -> (i32, i32) {
    %c0_i32 = arith.constant 0 : i32
    %c0_i32_0 = arith.constant 0 : i32
    return %c0_i32, %arg1 : i32, i32
  }
  func.func @transform_3(%arg0: i32, %arg1: i32) -> (i32, i32) {
    %c0_i32 = arith.constant 0 : i32
    %c0_i32_0 = arith.constant 0 : i32
    return %c0_i32, %arg1 : i32, i32
  }
  func.func @transform_4(%arg0: i32, %arg1: i32) -> (i32, i32) {
    %c0_i32 = arith.constant 0 : i32
    return %arg0, %arg1 : i32, i32
  }
}

module attributes {stable_mosaic.version = 11 : i64} {
  func.func @_attn_head_kernel(%arg0: i32, %arg1: i32, %arg2: memref<1x1x16x16xbf16, #tpu.memory_space<vmem>>, %arg3: memref<1x1x16x16xbf16, #tpu.memory_space<vmem>>, %arg4: memref<1x1x16x16xbf16, #tpu.memory_space<vmem>>, %arg5: memref<16x16xf32, #tpu.memory_space<vmem>>, %arg6: memref<16x16xf32, #tpu.memory_space<vmem>>, %arg7: memref<1x1x16x16xbf16, #tpu.memory_space<vmem>>) attributes {dimension_semantics = [#tpu.dimension_semantics<parallel>, #tpu.dimension_semantics<parallel>], iteration_bounds = array<i64: 2, 4>, scalar_prefetch = 0 : i64, scratch_operands = 0 : i64, tpu.core_type = #tpu.core_type<tc>, window_params = [{transform_indices = @transform_0, window_bounds = array<i64: 1, 1, 16, 16>}, {transform_indices = @transform_1, window_bounds = array<i64: 1, 1, 16, 16>}, {transform_indices = @transform_2, window_bounds = array<i64: 1, 1, 16, 16>}, {pipeline_mode = #tpu.pipeline_mode<synchronous>, transform_indices = @transform_3, window_bounds = array<i64: 16, 16>}, {pipeline_mode = #tpu.pipeline_mode<synchronous>, transform_indices = @transform_4, window_bounds = array<i64: 16, 16>}, {transform_indices = @transform_5, window_bounds = array<i64: 1, 1, 16, 16>}]} {
    %c0 = arith.constant 0 : index
    %c0_0 = arith.constant 0 : index
    %c0_1 = arith.constant 0 : index
    %c0_2 = arith.constant 0 : index
    %0 = vector.load %arg2[%c0, %c0_0, %c0_1, %c0_2] : memref<1x1x16x16xbf16, #tpu.memory_space<vmem>>, vector<1x1x16x16xbf16>
    %1 = vector.shape_cast %0 : vector<1x1x16x16xbf16> to vector<16x16xbf16>
    %2 = arith.extf %1 : vector<16x16xbf16> to vector<16x16xf32>
    %c0_3 = arith.constant 0 : index
    %c0_4 = arith.constant 0 : index
    %c0_5 = arith.constant 0 : index
    %c0_6 = arith.constant 0 : index
    %3 = vector.load %arg3[%c0_3, %c0_4, %c0_5, %c0_6] : memref<1x1x16x16xbf16, #tpu.memory_space<vmem>>, vector<1x1x16x16xbf16>
    %4 = vector.shape_cast %3 : vector<1x1x16x16xbf16> to vector<16x16xbf16>
    %5 = arith.extf %4 : vector<16x16xbf16> to vector<16x16xf32>
    %c0_7 = arith.constant 0 : index
    %c0_8 = arith.constant 0 : index
    %c0_9 = arith.constant 0 : index
    %c0_10 = arith.constant 0 : index
    %6 = vector.load %arg4[%c0_7, %c0_8, %c0_9, %c0_10] : memref<1x1x16x16xbf16, #tpu.memory_space<vmem>>, vector<1x1x16x16xbf16>
    %7 = vector.shape_cast %6 : vector<1x1x16x16xbf16> to vector<16x16xbf16>
    %c0_11 = arith.constant 0 : index
    %c0_12 = arith.constant 0 : index
    %8 = vector.load %arg5[%c0_11, %c0_12] : memref<16x16xf32, #tpu.memory_space<vmem>>, vector<16x16xf32>
    %c0_13 = arith.constant 0 : index
    %c0_14 = arith.constant 0 : index
    %9 = vector.load %arg6[%c0_13, %c0_14] : memref<16x16xf32, #tpu.memory_space<vmem>>, vector<16x16xf32>
    %10 = arith.mulf %2, %8 : vector<16x16xf32>
    %11 = vector.extract_strided_slice %2 {offsets = [0, 8], sizes = [16, 8], strides = [1, 1]} : vector<16x16xf32> to vector<16x8xf32>
    %cst = arith.constant 0.000000e+00 : f32
    %12 = vector.broadcast %cst : f32 to vector<16x8xf32>
    %13 = arith.subf %12, %11 : vector<16x8xf32>
    %14 = vector.extract_strided_slice %2 {offsets = [0, 0], sizes = [16, 8], strides = [1, 1]} : vector<16x16xf32> to vector<16x8xf32>
    %15 = tpu.concatenate %13, %14 in 1 : vector<16x8xf32>, vector<16x8xf32> -> vector<16x16xf32>
    %16 = arith.mulf %15, %9 : vector<16x16xf32>
    %17 = arith.addf %10, %16 : vector<16x16xf32>
    %18 = arith.mulf %5, %8 : vector<16x16xf32>
    %19 = vector.extract_strided_slice %5 {offsets = [0, 8], sizes = [16, 8], strides = [1, 1]} : vector<16x16xf32> to vector<16x8xf32>
    %cst_15 = arith.constant 0.000000e+00 : f32
    %20 = vector.broadcast %cst_15 : f32 to vector<16x8xf32>
    %21 = arith.subf %20, %19 : vector<16x8xf32>
    %22 = vector.extract_strided_slice %5 {offsets = [0, 0], sizes = [16, 8], strides = [1, 1]} : vector<16x16xf32> to vector<16x8xf32>
    %23 = tpu.concatenate %21, %22 in 1 : vector<16x8xf32>, vector<16x8xf32> -> vector<16x16xf32>
    %24 = arith.mulf %23, %9 : vector<16x16xf32>
    %25 = arith.addf %18, %24 : vector<16x16xf32>
    %cst_16 = arith.constant 2.500000e-01 : f32
    %26 = vector.broadcast %cst_16 : f32 to vector<16x16xf32>
    %27 = arith.mulf %17, %26 : vector<16x16xf32>
    %28 = arith.truncf %27 : vector<16x16xf32> to vector<16x16xbf16>
    %29 = arith.truncf %25 : vector<16x16xf32> to vector<16x16xbf16>
    %cst_17 = arith.constant dense<0.000000e+00> : vector<16x16xf32>
    %30 = tpu.matmul %28, %29, %cst_17 {dimension_numbers = #tpu.dot_dimension_numbers<[1], [1], [0], [0], [0, 0, 1, 0], [], []>} : vector<16x16xbf16>, vector<16x16xbf16>, vector<16x16xf32> -> vector<16x16xf32>
    %31 = tpu.iota {dimensions = array<i32: 0>} : vector<16x16xi32>
    %32 = tpu.iota {dimensions = array<i32: 1>} : vector<16x16xi32>
    %33 = arith.cmpi sle, %32, %31 : vector<16x16xi32>
    %cst_18 = arith.constant 0xFF800000 : f32
    %34 = vector.broadcast %cst_18 : f32 to vector<16x16xf32>
    %35 = arith.select %33, %30, %34 : vector<16x16xi1>, vector<16x16xf32>
    %cst_19 = arith.constant dense<0xFF800000> : vector<16xf32>
    %36 = vector.multi_reduction <maximumf>, %35, %cst_19 [1] : vector<16x16xf32> to vector<16xf32>
    %37 = vector.shape_cast %36 : vector<16xf32> to vector<16x1xf32>
    %38 = vector.broadcast %37 : vector<16x1xf32> to vector<16x16xf32>
    %39 = arith.subf %35, %38 : vector<16x16xf32>
    %40 = math.exp %39 : vector<16x16xf32>
    %cst_20 = arith.constant dense<0.000000e+00> : vector<16xf32>
    %41 = vector.multi_reduction <add>, %40, %cst_20 [1] : vector<16x16xf32> to vector<16xf32>
    %42 = vector.shape_cast %41 : vector<16xf32> to vector<16x1xf32>
    %43 = vector.broadcast %42 : vector<16x1xf32> to vector<16x16xf32>
    %44 = arith.divf %40, %43 : vector<16x16xf32>
    %45 = arith.truncf %44 : vector<16x16xf32> to vector<16x16xbf16>
    %cst_21 = arith.constant dense<0.000000e+00> : vector<16x16xf32>
    %46 = tpu.matmul %45, %7, %cst_21 {dimension_numbers = #tpu.dot_dimension_numbers<[1], [0], [0], [1], [0, 0, 1, 1], [], []>} : vector<16x16xbf16>, vector<16x16xbf16>, vector<16x16xf32> -> vector<16x16xf32>
    %47 = arith.truncf %46 : vector<16x16xf32> to vector<16x16xbf16>
    %c0_22 = arith.constant 0 : index
    %c0_23 = arith.constant 0 : index
    %c0_24 = arith.constant 0 : index
    %c0_25 = arith.constant 0 : index
    %48 = vector.load %arg7[%c0_22, %c0_23, %c0_24, %c0_25] : memref<1x1x16x16xbf16, #tpu.memory_space<vmem>>, vector<1x1x16x16xbf16>
    %49 = vector.shape_cast %48 : vector<1x1x16x16xbf16> to vector<16x16xbf16>
    %50 = vector.shape_cast %47 : vector<16x16xbf16> to vector<1x1x16x16xbf16>
    tpu.vector_store %arg7[%c0_22, %c0_23, %c0_24, %c0_25], %50 {strides = array<i32>} : memref<1x1x16x16xbf16, #tpu.memory_space<vmem>>, vector<1x1x16x16xbf16>,
    return
  }
  func.func @transform_0(%arg0: i32, %arg1: i32) -> (i32, i32, i32, i32) {
    %c0_i32 = arith.constant 0 : i32
    %c0_i32_0 = arith.constant 0 : i32
    %c0_i32_1 = arith.constant 0 : i32
    return %arg0, %arg1, %c0_i32, %c0_i32_0 : i32, i32, i32, i32
  }
  func.func @transform_1(%arg0: i32, %arg1: i32) -> (i32, i32, i32, i32) {
    %c0_i32 = arith.constant 0 : i32
    %c0_i32_0 = arith.constant 0 : i32
    %c0_i32_1 = arith.constant 0 : i32
    return %arg0, %arg1, %c0_i32, %c0_i32_0 : i32, i32, i32, i32
  }
  func.func @transform_2(%arg0: i32, %arg1: i32) -> (i32, i32, i32, i32) {
    %c0_i32 = arith.constant 0 : i32
    %c0_i32_0 = arith.constant 0 : i32
    %c0_i32_1 = arith.constant 0 : i32
    return %arg0, %arg1, %c0_i32, %c0_i32_0 : i32, i32, i32, i32
  }
  func.func @transform_3(%arg0: i32, %arg1: i32) -> (i32, i32) {
    %c0_i32 = arith.constant 0 : i32
    %c0_i32_0 = arith.constant 0 : i32
    %c0_i32_1 = arith.constant 0 : i32
    return %c0_i32, %c0_i32_0 : i32, i32
  }
  func.func @transform_4(%arg0: i32, %arg1: i32) -> (i32, i32) {
    %c0_i32 = arith.constant 0 : i32
    %c0_i32_0 = arith.constant 0 : i32
    %c0_i32_1 = arith.constant 0 : i32
    return %c0_i32, %c0_i32_0 : i32, i32
  }
  func.func @transform_5(%arg0: i32, %arg1: i32) -> (i32, i32, i32, i32) {
    %c0_i32 = arith.constant 0 : i32
    %c0_i32_0 = arith.constant 0 : i32
    %c0_i32_1 = arith.constant 0 : i32
    return %arg0, %arg1, %c0_i32, %c0_i32_0 : i32, i32, i32, i32
  }
}

module attributes {stable_mosaic.version = 11 : i64} {
  func.func @kernel(%arg0: i32, %arg1: i32, %arg2: memref<32x64xbf16, #tpu.memory_space<vmem>>, %arg3: memref<64x64xbf16, #tpu.memory_space<vmem>>, %arg4: memref<1x64xf32, #tpu.memory_space<vmem>>, %arg5: memref<32x64xf32, #tpu.memory_space<vmem>>, %arg6: memref<32x64xf32, #tpu.memory_space<vmem>>) attributes {dimension_semantics = [#tpu.dimension_semantics<parallel>, #tpu.dimension_semantics<arbitrary>], iteration_bounds = array<i64: 1, 1>, scalar_prefetch = 0 : i64, scratch_operands = 0 : i64, tpu.core_type = #tpu.core_type<tc>, window_params = [{transform_indices = @transform_0, window_bounds = array<i64: 32, 64>}, {transform_indices = @transform_1, window_bounds = array<i64: 64, 64>}, {transform_indices = @transform_2, window_bounds = array<i64: 1, 64>}, {transform_indices = @transform_3, window_bounds = array<i64: 32, 64>}, {transform_indices = @transform_4, window_bounds = array<i64: 32, 64>}]} {
    %c0 = arith.constant 0 : index
    %c0_0 = arith.constant 0 : index
    %0 = vector.load %arg2[%c0, %c0_0] : memref<32x64xbf16, #tpu.memory_space<vmem>>, vector<32x64xbf16>
    %c0_1 = arith.constant 0 : index
    %c0_2 = arith.constant 0 : index
    %1 = vector.load %arg3[%c0_1, %c0_2] : memref<64x64xbf16, #tpu.memory_space<vmem>>, vector<64x64xbf16>
    %cst = arith.constant dense<0.000000e+00> : vector<32x64xf32>
    %2 = tpu.matmul %0, %1, %cst {dimension_numbers = #tpu.dot_dimension_numbers<[1], [0], [0], [1], [0, 0, 1, 1], [], []>} : vector<32x64xbf16>, vector<64x64xbf16>, vector<32x64xf32> -> vector<32x64xf32>
    %c0_3 = arith.constant 0 : index
    %c0_4 = arith.constant 0 : index
    %3 = vector.load %arg4[%c0_3, %c0_4] : memref<1x64xf32, #tpu.memory_space<vmem>>, vector<1x64xf32>
    %4 = vector.broadcast %3 : vector<1x64xf32> to vector<32x64xf32>
    %5 = arith.addf %2, %4 : vector<32x64xf32>
    %c0_5 = arith.constant 0 : index
    %c0_6 = arith.constant 0 : index
    %6 = vector.load %arg5[%c0_5, %c0_6] : memref<32x64xf32, #tpu.memory_space<vmem>>, vector<32x64xf32>
    %7 = arith.addf %5, %6 : vector<32x64xf32>
    %c0_7 = arith.constant 0 : index
    %c0_8 = arith.constant 0 : index
    %8 = vector.load %arg6[%c0_7, %c0_8] : memref<32x64xf32, #tpu.memory_space<vmem>>, vector<32x64xf32>
    tpu.vector_store %arg6[%c0_7, %c0_8], %7 {strides = array<i32>} : memref<32x64xf32, #tpu.memory_space<vmem>>, vector<32x64xf32>,
    return
  }
  func.func @transform_0(%arg0: i32, %arg1: i32) -> (i32, i32) {
    %c0_i32 = arith.constant 0 : i32
    %c0_i32_0 = arith.constant 0 : i32
    return %arg0, %c0_i32 : i32, i32
  }
  func.func @transform_1(%arg0: i32, %arg1: i32) -> (i32, i32) {
    %c0_i32 = arith.constant 0 : i32
    %c0_i32_0 = arith.constant 0 : i32
    return %c0_i32, %arg1 : i32, i32
  }
  func.func @transform_2(%arg0: i32, %arg1: i32) -> (i32, i32) {
    %c0_i32 = arith.constant 0 : i32
    %c0_i32_0 = arith.constant 0 : i32
    return %c0_i32, %arg1 : i32, i32
  }
  func.func @transform_3(%arg0: i32, %arg1: i32) -> (i32, i32) {
    %c0_i32 = arith.constant 0 : i32
    return %arg0, %arg1 : i32, i32
  }
  func.func @transform_4(%arg0: i32, %arg1: i32) -> (i32, i32) {
    %c0_i32 = arith.constant 0 : i32
    return %arg0, %arg1 : i32, i32
  }
}

module attributes {stable_mosaic.version = 11 : i64} {
  func.func @kernel(%arg0: i32, %arg1: i32, %arg2: memref<32x64xf32, #tpu.memory_space<vmem>>, %arg3: memref<1x64xf32, #tpu.memory_space<vmem>>, %arg4: memref<64x256xbf16, #tpu.memory_space<vmem>>, %arg5: memref<1x256xf32, #tpu.memory_space<vmem>>, %arg6: memref<32x256xbf16, #tpu.memory_space<vmem>>, %arg7: memref<32x64xbf16, #tpu.memory_space<vmem>>) attributes {dimension_semantics = [#tpu.dimension_semantics<parallel>, #tpu.dimension_semantics<arbitrary>], iteration_bounds = array<i64: 1, 1>, scalar_prefetch = 0 : i64, scratch_operands = 1 : i64, tpu.core_type = #tpu.core_type<tc>, window_params = [{transform_indices = @transform_0, window_bounds = array<i64: 32, 64>}, {pipeline_mode = #tpu.pipeline_mode<synchronous>, transform_indices = @transform_1, window_bounds = array<i64: 1, 64>}, {transform_indices = @transform_2, window_bounds = array<i64: 64, 256>}, {transform_indices = @transform_3, window_bounds = array<i64: 1, 256>}, {transform_indices = @transform_4, window_bounds = array<i64: 32, 256>}]} {
    %c0_i32 = arith.constant 0 : i32
    %0 = arith.cmpi eq, %arg1, %c0_i32 : i32
    %1 = arith.extui %0 : i1 to i32
    %c0_i32_0 = arith.constant 0 : i32
    %2 = arith.cmpi ne, %1, %c0_i32_0 : i32
    scf.if %2 {
      %c0_12 = arith.constant 0 : index
      %c0_13 = arith.constant 0 : index
      %24 = vector.load %arg2[%c0_12, %c0_13] : memref<32x64xf32, #tpu.memory_space<vmem>>, vector<32x64xf32>
      %25 = arith.mulf %24, %24 : vector<32x64xf32>
      %cst_14 = arith.constant dense<0.000000e+00> : vector<32xf32>
      %26 = vector.multi_reduction <add>, %25, %cst_14 [1] : vector<32x64xf32> to vector<32xf32>
      %27 = vector.shape_cast %26 : vector<32xf32> to vector<32x1xf32>
      %28 = math.sqrt %27 : vector<32x1xf32>
      %cst_15 = arith.constant 1.250000e-01 : f32
      %29 = vector.broadcast %cst_15 : f32 to vector<32x1xf32>
      %30 = arith.mulf %28, %29 : vector<32x1xf32>
      %c0_16 = arith.constant 0 : index
      %c0_17 = arith.constant 0 : index
      %31 = vector.load %arg3[%c0_16, %c0_17] : memref<1x64xf32, #tpu.memory_space<vmem>>, vector<1x64xf32>
      %cst_18 = arith.constant 9.99999974E-6 : f32
      %32 = vector.broadcast %cst_18 : f32 to vector<32x1xf32>
      %33 = arith.addf %30, %32 : vector<32x1xf32>
      %34 = vector.broadcast %33 : vector<32x1xf32> to vector<32x64xf32>
      %35 = arith.divf %24, %34 : vector<32x64xf32>
      %36 = vector.broadcast %31 : vector<1x64xf32> to vector<32x64xf32>
      %37 = arith.mulf %36, %35 : vector<32x64xf32>
      %38 = arith.truncf %37 : vector<32x64xf32> to vector<32x64xbf16>
      %c0_19 = arith.constant 0 : index
      %c0_20 = arith.constant 0 : index
      %39 = vector.load %arg7[%c0_19, %c0_20] : memref<32x64xbf16, #tpu.memory_space<vmem>>, vector<32x64xbf16>
      tpu.vector_store %arg7[%c0_19, %c0_20], %38 {strides = array<i32>} : memref<32x64xbf16, #tpu.memory_space<vmem>>, vector<32x64xbf16>,
    } else {
    }
    %c0 = arith.constant 0 : index
    %c0_1 = arith.constant 0 : index
    %3 = vector.load %arg7[%c0, %c0_1] : memref<32x64xbf16, #tpu.memory_space<vmem>>, vector<32x64xbf16>
    %c0_2 = arith.constant 0 : index
    %c0_3 = arith.constant 0 : index
    %4 = vector.load %arg4[%c0_2, %c0_3] : memref<64x256xbf16, #tpu.memory_space<vmem>>, vector<64x256xbf16>
    %cst = arith.constant dense<0.000000e+00> : vector<32x256xf32>
    %5 = tpu.matmul %3, %4, %cst {dimension_numbers = #tpu.dot_dimension_numbers<[1], [0], [0], [1], [0, 0, 1, 1], [], []>} : vector<32x64xbf16>, vector<64x256xbf16>, vector<32x256xf32> -> vector<32x256xf32>
    %c0_4 = arith.constant 0 : index
    %c0_5 = arith.constant 0 : index
    %6 = vector.load %arg5[%c0_4, %c0_5] : memref<1x256xf32, #tpu.memory_space<vmem>>, vector<1x256xf32>
    %7 = vector.broadcast %6 : vector<1x256xf32> to vector<32x256xf32>
    %8 = arith.addf %5, %7 : vector<32x256xf32>
    %cst_6 = arith.constant 5.000000e-01 : f32
    %9 = vector.broadcast %cst_6 : f32 to vector<32x256xf32>
    %10 = arith.mulf %9, %8 : vector<32x256xf32>
    %11 = arith.mulf %8, %8 : vector<32x256xf32>
    %12 = arith.mulf %11, %8 : vector<32x256xf32>
    %cst_7 = arith.constant 4.471500e-02 : f32
    %13 = vector.broadcast %cst_7 : f32 to vector<32x256xf32>
    %14 = arith.mulf %13, %12 : vector<32x256xf32>
    %15 = arith.addf %8, %14 : vector<32x256xf32>
    %cst_8 = arith.constant 0.797884583 : f32
    %16 = vector.broadcast %cst_8 : f32 to vector<32x256xf32>
    %17 = arith.mulf %16, %15 : vector<32x256xf32>
    %18 = math.tanh %17 : vector<32x256xf32>
    %cst_9 = arith.constant 1.000000e+00 : f32
    %19 = vector.broadcast %cst_9 : f32 to vector<32x256xf32>
    %20 = arith.addf %19, %18 : vector<32x256xf32>
    %21 = arith.mulf %10, %20 : vector<32x256xf32>
    %22 = arith.truncf %21 : vector<32x256xf32> to vector<32x256xbf16>
    %c0_10 = arith.constant 0 : index
    %c0_11 = arith.constant 0 : index
    %23 = vector.load %arg6[%c0_10, %c0_11] : memref<32x256xbf16, #tpu.memory_space<vmem>>, vector<32x256xbf16>
    tpu.vector_store %arg6[%c0_10, %c0_11], %22 {strides = array<i32>} : memref<32x256xbf16, #tpu.memory_space<vmem>>, vector<32x256xbf16>,
    return
  }
  func.func @transform_0(%arg0: i32, %arg1: i32) -> (i32, i32) {
    %c0_i32 = arith.constant 0 : i32
    %c0_i32_0 = arith.constant 0 : i32
    return %arg0, %c0_i32 : i32, i32
  }
  func.func @transform_1(%arg0: i32, %arg1: i32) -> (i32, i32) {
    %c0_i32 = arith.constant 0 : i32
    %c0_i32_0 = arith.constant 0 : i32
    %c0_i32_1 = arith.constant 0 : i32
    return %c0_i32, %c0_i32_0 : i32, i32
  }
  func.func @transform_2(%arg0: i32, %arg1: i32) -> (i32, i32) {
    %c0_i32 = arith.constant 0 : i32
    %c0_i32_0 = arith.constant 0 : i32
    return %c0_i32, %arg1 : i32, i32
  }
  func.func @transform_3(%arg0: i32, %arg1: i32) -> (i32, i32) {
    %c0_i32 = arith.constant 0 : i32
    %c0_i32_0 = arith.constant 0 : i32
    return %c0_i32, %arg1 : i32, i32
  }
  func.func @transform_4(%arg0: i32, %arg1: i32) -> (i32, i32) {
    %c0_i32 = arith.constant 0 : i32
    return %arg0, %arg1 : i32, i32
  }
}

module attributes {stable_mosaic.version = 11 : i64} {
  func.func @kernel(%arg0: i32, %arg1: i32, %arg2: memref<32x256xbf16, #tpu.memory_space<vmem>>, %arg3: memref<256x64xbf16, #tpu.memory_space<vmem>>, %arg4: memref<1x64xf32, #tpu.memory_space<vmem>>, %arg5: memref<32x64xf32, #tpu.memory_space<vmem>>, %arg6: memref<32x64xf32, #tpu.memory_space<vmem>>) attributes {dimension_semantics = [#tpu.dimension_semantics<parallel>, #tpu.dimension_semantics<arbitrary>], iteration_bounds = array<i64: 1, 1>, scalar_prefetch = 0 : i64, scratch_operands = 0 : i64, tpu.core_type = #tpu.core_type<tc>, window_params = [{transform_indices = @transform_0, window_bounds = array<i64: 32, 256>}, {transform_indices = @transform_1, window_bounds = array<i64: 256, 64>}, {transform_indices = @transform_2, window_bounds = array<i64: 1, 64>}, {transform_indices = @transform_3, window_bounds = array<i64: 32, 64>}, {transform_indices = @transform_4, window_bounds = array<i64: 32, 64>}]} {
    %c0 = arith.constant 0 : index
    %c0_0 = arith.constant 0 : index
    %0 = vector.load %arg2[%c0, %c0_0] : memref<32x256xbf16, #tpu.memory_space<vmem>>, vector<32x256xbf16>
    %c0_1 = arith.constant 0 : index
    %c0_2 = arith.constant 0 : index
    %1 = vector.load %arg3[%c0_1, %c0_2] : memref<256x64xbf16, #tpu.memory_space<vmem>>, vector<256x64xbf16>
    %cst = arith.constant dense<0.000000e+00> : vector<32x64xf32>
    %2 = tpu.matmul %0, %1, %cst {dimension_numbers = #tpu.dot_dimension_numbers<[1], [0], [0], [1], [0, 0, 1, 1], [], []>} : vector<32x256xbf16>, vector<256x64xbf16>, vector<32x64xf32> -> vector<32x64xf32>
    %c0_3 = arith.constant 0 : index
    %c0_4 = arith.constant 0 : index
    %3 = vector.load %arg4[%c0_3, %c0_4] : memref<1x64xf32, #tpu.memory_space<vmem>>, vector<1x64xf32>
    %4 = vector.broadcast %3 : vector<1x64xf32> to vector<32x64xf32>
    %5 = arith.addf %2, %4 : vector<32x64xf32>
    %c0_5 = arith.constant 0 : index
    %c0_6 = arith.constant 0 : index
    %6 = vector.load %arg5[%c0_5, %c0_6] : memref<32x64xf32, #tpu.memory_space<vmem>>, vector<32x64xf32>
    %7 = arith.addf %5, %6 : vector<32x64xf32>
    %c0_7 = arith.constant 0 : index
    %c0_8 = arith.constant 0 : index
    %8 = vector.load %arg6[%c0_7, %c0_8] : memref<32x64xf32, #tpu.memory_space<vmem>>, vector<32x64xf32>
    tpu.vector_store %arg6[%c0_7, %c0_8], %7 {strides = array<i32>} : memref<32x64xf32, #tpu.memory_space<vmem>>, vector<32x64xf32>,
    return
  }
  func.func @transform_0(%arg0: i32, %arg1: i32) -> (i32, i32) {
    %c0_i32 = arith.constant 0 : i32
    %c0_i32_0 = arith.constant 0 : i32
    return %arg0, %c0_i32 : i32, i32
  }
  func.func @transform_1(%arg0: i32, %arg1: i32) -> (i32, i32) {
    %c0_i32 = arith.constant 0 : i32
    %c0_i32_0 = arith.constant 0 : i32
    return %c0_i32, %arg1 : i32, i32
  }
  func.func @transform_2(%arg0: i32, %arg1: i32) -> (i32, i32) {
    %c0_i32 = arith.constant 0 : i32
    %c0_i32_0 = arith.constant 0 : i32
    return %c0_i32, %arg1 : i32, i32
  }
  func.func @transform_3(%arg0: i32, %arg1: i32) -> (i32, i32) {
    %c0_i32 = arith.constant 0 : i32
    return %arg0, %arg1 : i32, i32
  }
  func.func @transform_4(%arg0: i32, %arg1: i32) -> (i32, i32) {
    %c0_i32 = arith.constant 0 : i32
    return %arg0, %arg1 : i32, i32
  }
}

module attributes {stable_mosaic.version = 11 : i64} {
  func.func @kernel(%arg0: i32, %arg1: i32, %arg2: memref<32x64xf32, #tpu.memory_space<vmem>>, %arg3: memref<1x64xf32, #tpu.memory_space<vmem>>, %arg4: memref<64x256xbf16, #tpu.memory_space<vmem>>, %arg5: memref<32x256xf32, #tpu.memory_space<vmem>>, %arg6: memref<32x64xbf16, #tpu.memory_space<vmem>>) attributes {dimension_semantics = [#tpu.dimension_semantics<parallel>, #tpu.dimension_semantics<arbitrary>], iteration_bounds = array<i64: 1, 1>, scalar_prefetch = 0 : i64, scratch_operands = 1 : i64, tpu.core_type = #tpu.core_type<tc>, window_params = [{transform_indices = @transform_0, window_bounds = array<i64: 32, 64>}, {pipeline_mode = #tpu.pipeline_mode<synchronous>, transform_indices = @transform_1, window_bounds = array<i64: 1, 64>}, {transform_indices = @transform_2, window_bounds = array<i64: 64, 256>}, {transform_indices = @transform_3, window_bounds = array<i64: 32, 256>}]} {
    %c0_i32 = arith.constant 0 : i32
    %0 = arith.cmpi eq, %arg1, %c0_i32 : i32
    %1 = arith.extui %0 : i1 to i32
    %c0_i32_0 = arith.constant 0 : i32
    %2 = arith.cmpi ne, %1, %c0_i32_0 : i32
    scf.if %2 {
      %c0_6 = arith.constant 0 : index
      %c0_7 = arith.constant 0 : index
      %7 = vector.load %arg2[%c0_6, %c0_7] : memref<32x64xf32, #tpu.memory_space<vmem>>, vector<32x64xf32>
      %8 = arith.mulf %7, %7 : vector<32x64xf32>
      %cst_8 = arith.constant dense<0.000000e+00> : vector<32xf32>
      %9 = vector.multi_reduction <add>, %8, %cst_8 [1] : vector<32x64xf32> to vector<32xf32>
      %10 = vector.shape_cast %9 : vector<32xf32> to vector<32x1xf32>
      %11 = math.sqrt %10 : vector<32x1xf32>
      %cst_9 = arith.constant 1.250000e-01 : f32
      %12 = vector.broadcast %cst_9 : f32 to vector<32x1xf32>
      %13 = arith.mulf %11, %12 : vector<32x1xf32>
      %c0_10 = arith.constant 0 : index
      %c0_11 = arith.constant 0 : index
      %14 = vector.load %arg3[%c0_10, %c0_11] : memref<1x64xf32, #tpu.memory_space<vmem>>, vector<1x64xf32>
      %cst_12 = arith.constant 9.99999974E-6 : f32
      %15 = vector.broadcast %cst_12 : f32 to vector<32x1xf32>
      %16 = arith.addf %13, %15 : vector<32x1xf32>
      %17 = vector.broadcast %16 : vector<32x1xf32> to vector<32x64xf32>
      %18 = arith.divf %7, %17 : vector<32x64xf32>
      %19 = vector.broadcast %14 : vector<1x64xf32> to vector<32x64xf32>
      %20 = arith.mulf %19, %18 : vector<32x64xf32>
      %21 = arith.truncf %20 : vector<32x64xf32> to vector<32x64xbf16>
      %c0_13 = arith.constant 0 : index
      %c0_14 = arith.constant 0 : index
      %22 = vector.load %arg6[%c0_13, %c0_14] : memref<32x64xbf16, #tpu.memory_space<vmem>>, vector<32x64xbf16>
      tpu.vector_store %arg6[%c0_13, %c0_14], %21 {strides = array<i32>} : memref<32x64xbf16, #tpu.memory_space<vmem>>, vector<32x64xbf16>,
    } else {
    }
    %c0 = arith.constant 0 : index
    %c0_1 = arith.constant 0 : index
    %3 = vector.load %arg6[%c0, %c0_1] : memref<32x64xbf16, #tpu.memory_space<vmem>>, vector<32x64xbf16>
    %c0_2 = arith.constant 0 : index
    %c0_3 = arith.constant 0 : index
    %4 = vector.load %arg4[%c0_2, %c0_3] : memref<64x256xbf16, #tpu.memory_space<vmem>>, vector<64x256xbf16>
    %cst = arith.constant dense<0.000000e+00> : vector<32x256xf32>
    %5 = tpu.matmul %3, %4, %cst {dimension_numbers = #tpu.dot_dimension_numbers<[1], [0], [0], [1], [0, 0, 1, 1], [], []>} : vector<32x64xbf16>, vector<64x256xbf16>, vector<32x256xf32> -> vector<32x256xf32>
    %c0_4 = arith.constant 0 : index
    %c0_5 = arith.constant 0 : index
    %6 = vector.load %arg5[%c0_4, %c0_5] : memref<32x256xf32, #tpu.memory_space<vmem>>, vector<32x256xf32>
    tpu.vector_store %arg5[%c0_4, %c0_5], %5 {strides = array<i32>} : memref<32x256xf32, #tpu.memory_space<vmem>>, vector<32x256xf32>,
    return
  }
  func.func @transform_0(%arg0: i32, %arg1: i32) -> (i32, i32) {
    %c0_i32 = arith.constant 0 : i32
    %c0_i32_0 = arith.constant 0 : i32
    return %arg0, %c0_i32 : i32, i32
  }
  func.func @transform_1(%arg0: i32, %arg1: i32) -> (i32, i32) {
    %c0_i32 = arith.constant 0 : i32
    %c0_i32_0 = arith.constant 0 : i32
    %c0_i32_1 = arith.constant 0 : i32
    return %c0_i32, %c0_i32_0 : i32, i32
  }
  func.func @transform_2(%arg0: i32, %arg1: i32) -> (i32, i32) {
    %c0_i32 = arith.constant 0 : i32
    %c0_i32_0 = arith.constant 0 : i32
    return %c0_i32, %arg1 : i32, i32
  }
  func.func @transform_3(%arg0: i32, %arg1: i32) -> (i32, i32) {
    %c0_i32 = arith.constant 0 : i32
    return %arg0, %arg1 : i32, i32
  }
}

</mosaic_0001>

<bundles_post_ra>
// kernel: gpt2_forward.12
= control target key start
LH: loop header
LB: loop body
LE: loop exit
PB: predicated region body
PF: predicated region fallthrough
CT: control target
= control target key end

     0   :  { %s811_s18 = smov 0   ;;  %s813_s19 = smov 0   ;;  %s897_s0 = inlined_call_operand.vmem [shape: bf16[2,4,16,16], index: 0, kind: input, shape index: {}]   ;;  %s898_s1 = inlined_call_operand.vmem [shape: bf16[2,4,16,16], index: 1, kind: input, shape index: {}]   ;;  %s899_s2 = inlined_call_operand.vmem [shape: bf16[2,4,16,16], index: 2, kind: input, shape index: {}]   ;;  %s900_s3 = inlined_call_operand.vmem [shape: f32[16,16], index: 3, kind: input, shape index: {}]   ;;  %s901_s4 = inlined_call_operand.vmem [shape: f32[16,16], index: 4, kind: input, shape index: {}]   ;;  %s902_s5 = inlined_call_operand.vmem [shape: bf16[2,4,16,16], index: 5, kind: output, shape index: {}]  }
   0x1   :  { %s815_s20 = smov 0   ;;  %s817_s21 = smov 0  }
   0x2   :  { %s819_s22 = smov 0  }
   0x3 LB: > { %s24_s23 = sadd.s32 1, %s769_s20  ;;  %s27_s24 = sadd.s32 1, %s773_s21  ;;  %s777_s22 = sphi %s819_s22, %s15_s22   ;;  %s773_s21 = sphi %s817_s21, %s906_s21   ;;  %s769_s20 = sphi %s815_s20, %s905_s20   ;;  %s765_s19 = sphi %s813_s19, %s904_s19   ;;  %s761_s18 = sphi %s811_s18, %s903_s18  }
   0x4   : > { %p25_p0 = scmp.ge.s32.totalorder %s24_s23, 4  ;;  %p649_p1 = scmp.ge.s32.totalorder %s777_s22, 1 }
   0x5   : > { %p239_p2 = scmp.lt.s32.totalorder %s777_s22, 9 }
   0x6   : > { %s908_s23 = smov (%p25_p0, %s24_s23), 0  ;;  %s910_s24 = smov (!%p25_p0, %s27_s24), %s773_s21 }
   0x7   : > { %p240_p3 = pnand %p649_p1, %p239_p2  ;;  %p29_p4 = scmp.ge.s32.totalorder %s910_s24, 2 }
   0x8   : > { %p293_p5 = scmp.lt.s32.totalorder (!%p240_p3), %s765_s19, 1  ;;  %p295_p6 = scmp.lt.s32.totalorder (!%p240_p3), %s761_s18, 3 }
   0x9   : > { %s912_s24 = smov (%p29_p4, %s910_s24), 0  ;;  %243 = sbr.rel (%p240_p3) target bundleno = 700 (0x2bc), region = 40 }
   0xa   : > { %s779_s10 = smov (!%p240_p3), 8   ;;  %s780_s11 = smov (!%p240_p3), 120  }
   0xe   : > { %s914_s19 = smov (!%p293_p5, %s765_s19), 1  ;;  %s916_s18 = smov (!%p295_p6, %s761_s18), 3  ;;  %vm364_vm0 = vcmask 64512   ;;  %v342_v18 = vld [vmem:[%s901_s4] sm:$0xff]  ;;  %v341_v23 = vld [vmem:[%s900_s3 + $0x8] sm:$0xff]  ;;  %vm401_vm1 = vcmask 130048   ;;  %v422_v47 = vlaneseq }
   0xf   : > { %s651_s25 = sshll.u32 %s914_s19, 3  ;;  %s650_s26 = sshll.u32 %s916_s18, 1  ;;  %v340_v22 = vld [vmem:[%s900_s3] sm:$0xff]  ;;  %v343_v29 = vld [vmem:[%s901_s4 + $0x8] sm:$0xff]  ;;  %vm505_vm12 = vcmask 125952  }
  0x10   : > { %s299_s27 = sadd.s32 %s651_s25, %s650_s26  ;;  %v423_v48 = vshrl.u32 %v422_v47, 7  ;;  %v426_v49 = vand.u32 127, %v422_v47 }
  0x11   : > { %s841_s28 = sshll.u32 %s299_s27, 2 }
  0x12   : > { %s310_s6 = scalar_lea.vmem %s898_s1, %s841_s28  ;;  %s301_s9 = scalar_lea.vmem %s897_s0, %s841_s28  ;;  %vm427_vm2 = vcmp.le.s32.totalorder %v426_v49, %v423_v48  ;;  %v424_v53 = vadd.s32 8, %v423_v48 }
  0x13   : > { %v676_v0 = vld [vmem:[%s310_s6] sm:$0xff]   ;;  %s319_s27 = scalar_lea.vmem %s899_s2, %s841_s28  ;;  %s328_s6 = scalar_lea.vmem %s902_s5, %s841_s28 }
  0x14   : > { %v672_v1 = vld [vmem:[%s301_s9] sm:$0xff]   ;;  %v677_v2 = vunpack.c.l.bf16 %v676_v0  ;;  %v678_v3 = vunpack.c.h.bf16 %v676_v0  ;;  %vm428_vm3 = vcmp.le.s32.totalorder %v426_v49, %v424_v53 }
  0x15   : > { %v674_v4 = vunpack.c.h.bf16 %v672_v1  ;;  %v673_v8 = vunpack.c.l.bf16 %v672_v1 }
  0x16   : > { %v721_v5 = vpack.i.bf16 %v678_v3, %v677_v2  ;;  %v373_v6 = vsub.f32 0.0, %v677_v2  ;;  %v374_v9 = vsub.f32 0.0, %v678_v3  ;;  %v371_v27 = vmul.f32 %v677_v2, %v340_v22 }
  0x17   : > { %v347_v7 = vsub.f32 0.0, %v674_v4  ;;  %v346_v10 = vsub.f32 0.0, %v673_v8  ;;  %v726_v11 = vpack.i.bf16 %v674_v4, %v673_v8  ;;  %v372_v28 = vmul.f32 %v678_v3, %v341_v23  ;;  %v670_v3 = vld [vmem:[%s319_s27] sm:$0xff] }
  0x18   : > { %722 = vrot.lane.b32.xlu1 %v721_v5, %s779_s10  ;;  %377 = vrot.lane.b32.xlu0 %v373_v6, %s780_s11  ;;  %v344_v34 = vmul.f32 %v673_v8, %v340_v22  ;;  %v345_v37 = vmul.f32 %v674_v4, %v341_v23 }
  0x19   : > { %352 = vrot.lane.b32.xlu2 %v347_v7, %s780_s11  ;;  %496 = vmatpush.bf16.msra.mxu1 %v670_v3 }
  0x20   : > { %379 = vrot.lane.b32.xlu0 %v374_v9, %s780_s11  ;;  %350 = vrot.lane.b32.xlu1 %v346_v10, %s780_s11 }
  0x21   : > { %727 = vrot.lane.b32.xlu2 %v726_v11, %s779_s10 }
  0x73   : > { %v353_v12 = vpop.permute.xlu2 %352 }
  0x7b   : > { %v728_v16 = vpop.permute.xlu2 %727 }
  0x7c   : > { %v730_v20 = vunpack.i.h.bf16 %v728_v16  ;;  %v729_v21 = vunpack.i.l.bf16 %v728_v16 }
  0x7e   : > { %v366_v30 = vsel %vm364_vm0, %v353_v12, %v730_v20 }
  0x7f   : > { %v368_v36 = vmul.f32 %v366_v30, %v343_v29 }
  0x81   : > { %v370_v43 = vadd.f32 %v368_v36, %v345_v37 }
  0x83   : > { %v398_v45 = vmul.f32 0.25, %v370_v43 }
  0x8a   : > { %v723_v13 = vpop.permute.xlu1 %722  ;;  %v378_v14 = vpop.permute.xlu0 %377 }
  0x8b   : > { %v724_v15 = vunpack.i.l.bf16 %v723_v13  ;;  %v725_v17 = vunpack.i.h.bf16 %v723_v13 }
  0x8d   : > { %v391_v19 = vsel %vm364_vm0, %v378_v14, %v724_v15 }
  0x8e   : > { %v393_v24 = vmul.f32 %v391_v19, %v342_v18 }
  0x90   : > { %v395_v38 = vadd.f32 %v393_v24, %v371_v27 }
  0x92   : > { %v380_v25 = vpop.permute.xlu0 %379  ;;  %v351_v26 = vpop.permute.xlu1 %350 }
  0x93   : > { %v392_v31 = vsel %vm364_vm0, %v380_v25, %v725_v17  ;;  %v365_v32 = vsel %vm364_vm0, %v351_v26, %v729_v21 }
  0x94   : > { %v394_v33 = vmul.f32 %v392_v31, %v343_v29  ;;  %v367_v35 = vmul.f32 %v365_v32, %v342_v18 }
  0x96   : > { %v396_v39 = vadd.f32 %v394_v33, %v372_v28  ;;  %v369_v40 = vadd.f32 %v367_v35, %v344_v34 }
  0x98   : > { %v400_v41 = vpack.c.bf16 %v396_v39, %v395_v38  ;;  %v397_v44 = vmul.f32 0.25, %v369_v40 }
  0x9a   : > { %v406_v42 = vsel %vm401_vm1, %v400_v41, 0  ;;  %v399_v46 = vpack.c.bf16 %v398_v45, %v397_v44 }
  0x9b   : > { %415 = vmatpush.bf16.xpose.msra.mxu0 %v406_v42 }
  0xa2   : > { %662 = vmatmul.msk.bf16.vlgmr.msra.gmra.mxu0 %vm401_vm1, %v399_v46 }
 0x11f   : > { %v417_v50 = vpop.f32.mrf.mxu0 }
 0x120   : > { %v429_v51 = vsel %vm427_vm2, %v417_v50, -inf }
 0x121   : > { %v431_v52 = vsel %vm401_vm1, %v429_v51, -inf }
 0x122   : > { %432 = vmax.xlane.f32.xlu0 %v431_v52 }
 0x127   : > { %v419_v54 = vpop.f32.mrf.mxu0 }
 0x128   : > { %v430_v55 = vsel %vm428_vm3, %v419_v54, -inf }
 0x129   : > { %v434_v56 = vsel %vm401_vm1, %v430_v55, -inf }
 0x12a   : > { %435 = vmax.xlane.f32.xlu1 %v434_v56 }
 0x195   : > { %v433_v57 = vpop.xlane.xlu0 %432 }
 0x196   : > { %v437_v58 = vsub.f32 %v429_v51, %v433_v57 }
 0x198   : > { %v439_v59 = vmul.f32 1.442695, %v437_v58 }
 0x19a   : > { %731 = vpow2.f32 %v439_v59 }
 0x19d   : > { %v436_v60 = vpop.xlane.xlu1 %435 }
 0x19e   : > { %v438_v61 = vsub.f32 %v430_v55, %v436_v60 }
 0x1a0   : > { %v732_v62 = vpop.eup %731  ;;  %v441_v63 = vmul.f32 1.442695, %v438_v61 }
 0x1a1   : > { %v443_v0 = vsel %vm401_vm1, %v732_v62, 0.0 }
 0x1a2   : > { %733 = vpow2.f32 %v441_v63  ;;  %444 = vadd.xlane.f32.xlu2 %v443_v0 }
 0x1a8   : > { %v734_v1 = vpop.eup %733 }
 0x1a9   : > { %v446_v2 = vsel %vm401_vm1, %v734_v1, 0.0 }
 0x1aa   : > { %447 = vadd.xlane.f32.xlu2 %v446_v2 }
 0x215   : > { %v445_v4 = vpop.xlane.xlu2 %444 }
 0x216   : > { %735 = vrcp.f32 %v445_v4  ;;  %v460_v13 = vand.u32 2147483648, %v445_v4  ;;  %vm454_vm5 = vweird.f32 %v445_v4  ;;  %v458_v14 = vand.u32 2147483647, %v445_v4 }
 0x218   : > { %v461_v20 = vor.u32 1.1754944e-38, %v460_v13  ;;  %vm459_vm8 = vcmp.eq.f32.partialorder %v458_v14, 8.507059e+37 }
 0x21c   : > { %v736_v5 = vpop.eup %735 }
 0x21d   : > { %v450_v6 = vmul.f32 %v736_v5, %v445_v4  ;;  %v448_v7 = vpop.xlane.xlu2 %447  ;;  %vm455_vm4 = vweird.f32 %v736_v5 }
 0x21e   : > { %737 = vrcp.f32 %v448_v7  ;;  %vm456_vm6 = vmor %vm454_vm5, %vm455_vm4  ;;  %v475_v16 = vand.u32 2147483648, %v448_v7  ;;  %v473_v18 = vand.u32 2147483647, %v448_v7  ;;  %vm469_vm9 = vweird.f32 %v448_v7 }
 0x21f   : > { %v451_v8 = vsub.f32 1.0, %v450_v6 }
 0x220   : > { %v476_v22 = vor.u32 1.1754944e-38, %v475_v16  ;;  %vm474_vm11 = vcmp.eq.f32.partialorder %v473_v18, 8.507059e+37 }
 0x221   : > { %v452_v9 = vmul.f32 %v736_v5, %v451_v8 }
 0x223   : > { %v453_v11 = vadd.f32 %v736_v5, %v452_v9 }
 0x224   : > { %v738_v10 = vpop.eup %737 }
 0x225   : > { %v465_v12 = vmul.f32 %v738_v10, %v448_v7  ;;  %vm470_vm7 = vweird.f32 %v738_v10  ;;  %v457_v19 = vsel %vm456_vm6, %v736_v5, %v453_v11 }
 0x226   : > { %vm471_vm10 = vmor %vm469_vm9, %vm470_vm7  ;;  %v462_v23 = vsel %vm459_vm8, %v461_v20, %v457_v19 }
 0x227   : > { %v466_v15 = vsub.f32 1.0, %v465_v12  ;;  %v463_v26 = vmul.f32 %v732_v62, %v462_v23 }
 0x229   : > { %v467_v17 = vmul.f32 %v738_v10, %v466_v15 }
 0x22b   : > { %v468_v21 = vadd.f32 %v738_v10, %v467_v17 }
 0x22d   : > { %v472_v24 = vsel %vm471_vm10, %v738_v10, %v468_v21 }
 0x22e   : > { %v477_v25 = vsel %vm474_vm11, %v476_v22, %v472_v24 }
 0x22f   : > { %v478_v27 = vmul.f32 %v734_v1, %v477_v25 }
 0x231   : > { %v479_v28 = vpack.c.bf16 %v478_v27, %v463_v26 }
 0x233   : > { %667 = vmatmul.msk.bf16.vlgmr.msra.gmra.mxu1 %vm401_vm1, %v479_v28 }
 0x2b0   : > { %v498_v29 = vpop.f32.mrf.mxu1 }
 0x2b1   : > { %v503_v30 = vpack.c.bf16 %v498_v29, %v498_v29 }
 0x2b3   : > { %506 = vst.msk [vmem:[%s328_s6] sm:$0xf] %vm505_vm12, %v503_v30 }
 0x2b8   : > { %v500_v31 = vpop.f32.mrf.mxu1 }
 0x2b9   : > { %v504_v32 = vpack.c.bf16 %v500_v31, %v500_v31 }
 0x2bb   : > { %507 = vst.msk [vmem:[%s328_s6 + $0x4] sm:$0xf] %vm505_vm12, %v504_v32 }
 0x2bc PF: > { %s15_s22 = sadd.s32 1, %s777_s22   ;;  %s903_s18 = smov %s769_s20 }
 0x2bd   : > { %p12_p7 = scmp.ge.s32.totalorder %s15_s22, 10   ;;  %s904_s19 = smov %s773_s21 }
 0x2be   : > { %s905_s20 = smov %s908_s23  ;;  %s906_s21 = smov %s912_s24 }
 0x2bf   :  { %14 = sbr.rel (!%p12_p7) target bundleno = 3 (0x3), region = 76 }

// kernel: gpt2_forward.11
= control target key start
LH: loop header
LB: loop body
LE: loop exit
PB: predicated region body
PF: predicated region fallthrough
CT: control target
= control target key end

     0   :  { %vm30_vm0 = vcmask 523264   ;;  %s576_s0 = inlined_call_operand.vmem [shape: f32[32,64], index: 0, kind: input, shape index: {}]   ;;  %s577_s1 = inlined_call_operand.vmem [shape: f32[1,64], index: 1, kind: input, shape index: {}]   ;;  %s578_s2 = inlined_call_operand.vmem [shape: bf16[64,192], index: 2, kind: input, shape index: {}]   ;;  %s579_s3 = inlined_call_operand.vmem [shape: f32[1,192], index: 3, kind: input, shape index: {}]   ;;  %s580_s4 = inlined_call_operand.vmem [shape: bf16[32,192], index: 4, kind: output, shape index: {}]  }
   0x1   :  { %v411_v0 = vld [vmem:[%s576_s0 + $0x10] sm:$0xff]  ;;  %v416_v1 = vld [vmem:[%s576_s0] sm:$0xff]  ;;  %v425_v4 = vld [vmem:[%s576_s0 + $0x18] sm:$0xff] }
   0x2   :  { %v28_v2 = vmul.f32 %v411_v0, %v411_v0  ;;  %v26_v3 = vmul.f32 %v416_v1, %v416_v1  ;;  %v430_v5 = vld [vmem:[%s576_s0 + $0x8] sm:$0xff]  ;;  %v29_v8 = vmul.f32 %v425_v4, %v425_v4  ;;  %v338_v40 = vld [vmem:[%s578_s2 + $0x30] sm:$0xf]  ;;  %v357_v41 = vld [vmem:[%s578_s2 + $0x34] sm:$0xf0] }
   0x3   :  { %v27_v9 = vmul.f32 %v430_v5, %v430_v5  ;;  %v339_v45 = vor.u32 %v357_v41, %v338_v40  ;;  %v356_v46 = vld [vmem:[%s578_s2 + $0x34] sm:$0xf]  ;;  %v340_v47 = vld [vmem:[%s578_s2 + $0x38] sm:$0xf0]  ;;  %v330_v56 = vld [vmem:[%s578_s2 + $0x20] sm:$0xf] }
   0x4   :  { %v37_v6 = vsel %vm30_vm0, %v28_v2, 0.0  ;;  %v31_v7 = vsel %vm30_vm0, %v26_v3, 0.0  ;;  %v40_v10 = vsel %vm30_vm0, %v29_v8, 0.0  ;;  %v343_v51 = vor.u32 %v356_v46, %v340_v47  ;;  %v355_v57 = vld [vmem:[%s578_s2 + $0x24] sm:$0xf0] }
   0x5   :  { %38 = vadd.xlane.f32.xlu0 %v37_v6  ;;  %32 = vadd.xlane.f32.xlu1 %v31_v7  ;;  %v34_v11 = vsel %vm30_vm0, %v27_v9, 0.0  ;;  %v331_v60 = vor.u32 %v355_v57, %v330_v56  ;;  %v354_v61 = vld [vmem:[%s578_s2 + $0x24] sm:$0xf]  ;;  %v332_v62 = vld [vmem:[%s578_s2 + $0x28] sm:$0xf0] }
   0x6   :  { %255 = vmatpush.bf16.msra.mxu0 %v339_v45  ;;  %358 = vmatpush.bf16.msra.mxu2 %v339_v45  ;;  %v322_v6 = vld [vmem:[%s578_s2 + $0x10] sm:$0xf]  ;;  %v353_v7 = vld [vmem:[%s578_s2 + $0x14] sm:$0xf0]  ;;  %v335_v9 = vor.u32 %v354_v61, %v332_v62 }
   0x7   :  { %274 = vmatpush.bf16.msra.mxu1 %v343_v51  ;;  %362 = vmatpush.bf16.msra.mxu3 %v343_v51 }
   0xa   :  { %256 = vmatpush.bf16.msra.mxu0 %v331_v60  ;;  %359 = vmatpush.bf16.msra.mxu2 %v331_v60 }
   0xb   :  { %275 = vmatpush.bf16.msra.mxu1 %v335_v9  ;;  %363 = vmatpush.bf16.msra.mxu3 %v335_v9 }
   0xd   :  { %41 = vadd.xlane.f32.xlu0 %v40_v10  ;;  %35 = vadd.xlane.f32.xlu1 %v34_v11  ;;  %v323_v10 = vor.u32 %v353_v7, %v322_v6  ;;  %v352_v11 = vld [vmem:[%s578_s2 + $0x14] sm:$0xf] }
   0xf   :  { %257 = vmatpush.bf16.msra.mxu0 %v323_v10  ;;  %360 = vmatpush.bf16.msra.mxu2 %v323_v10 }
  0x78   :  { %v39_v12 = vpop.xlane.xlu0 %38  ;;  %v33_v13 = vpop.xlane.xlu1 %32 }
  0x79   :  { %367 = vrsqrt.f32 %v39_v12  ;;  %vm74_vm1 = vcmp.eq.f32.partialorder %v39_v12, inf  ;;  %vm76_vm2 = vcmp.eq.f32.partialorder %v39_v12, 0.0  ;;  %v77_v33 = vand.u32 2147483648, %v39_v12 }
  0x7a   :  { %369 = vrsqrt.f32 %v33_v13  ;;  %vm50_vm3 = vcmp.eq.f32.partialorder %v33_v13, inf  ;;  %vm52_vm4 = vcmp.eq.f32.partialorder %v33_v13, 0.0  ;;  %v53_v38 = vand.u32 2147483648, %v33_v13 }
  0x7f   :  { %v368_v14 = vpop.eup %367 }
  0x80   :  { %v370_v15 = vpop.eup %369  ;;  %v68_v16 = vmul.f32 %v368_v14, %v39_v12  ;;  %v440_v17 = vpop.xlane.xlu0 %41 }
  0x81   :  { %v442_v18 = vpop.xlane.xlu1 %35  ;;  %v44_v19 = vmul.f32 %v370_v15, %v33_v13  ;;  %371 = vrsqrt.f32 %v440_v17  ;;  %vm86_vm5 = vcmp.eq.f32.partialorder %v440_v17, inf  ;;  %v89_v2 = vand.u32 2147483648, %v440_v17 }
  0x82   :  { %v69_v20 = vmul.f32 %v368_v14, %v68_v16  ;;  %373 = vrsqrt.f32 %v442_v18  ;;  %vm62_vm6 = vcmp.eq.f32.partialorder %v442_v18, inf  ;;  %v65_v8 = vand.u32 2147483648, %v442_v18  ;;  %v351_v16 = vld [vmem:[%s578_s2 + $0x4] sm:$0xf0] }
  0x83   :  { %v45_v21 = vmul.f32 %v370_v15, %v44_v19  ;;  %vm88_vm7 = vcmp.eq.f32.partialorder %v440_v17, 0.0  ;;  %vm64_vm8 = vcmp.eq.f32.partialorder %v442_v18, 0.0 }
  0x84   :  { %v70_v22 = vmul.f32 0.5, %v69_v20 }
  0x85   :  { %v46_v23 = vmul.f32 0.5, %v45_v21 }
  0x86   :  { %v71_v24 = vsub.f32 1.5, %v70_v22 }
  0x87   :  { %v372_v25 = vpop.eup %371  ;;  %v47_v26 = vsub.f32 1.5, %v46_v23 }
  0x88   :  { %v374_v27 = vpop.eup %373  ;;  %v72_v28 = vmul.f32 %v368_v14, %v71_v24  ;;  %v80_v29 = vmul.f32 %v372_v25, %v440_v17 }
  0x89   :  { %v48_v30 = vmul.f32 %v370_v15, %v47_v26  ;;  %v56_v31 = vmul.f32 %v374_v27, %v442_v18  ;;  %v314_v15 = vld [vmem:[%s578_s2] sm:$0xf] }
  0x8a   :  { %v73_v32 = vmul.f32 %v72_v28, %v39_v12  ;;  %v81_v34 = vmul.f32 %v372_v25, %v80_v29  ;;  %v315_v24 = vor.u32 %v351_v16, %v314_v15 }
  0x8b   :  { %v49_v35 = vmul.f32 %v48_v30, %v33_v13  ;;  %v57_v36 = vmul.f32 %v374_v27, %v56_v31 }
  0x8c   :  { %v75_v37 = vsel %vm74_vm1, %v39_v12, %v73_v32  ;;  %v82_v39 = vmul.f32 0.5, %v81_v34  ;;  %v324_v12 = vld [vmem:[%s578_s2 + $0x18] sm:$0xf0]  ;;  %258 = vmatpush.bf16.msra.mxu0 %v315_v24  ;;  %361 = vmatpush.bf16.msra.mxu2 %v315_v24 }
  0x8d   :  { %v78_v42 = vsel %vm76_vm2, %v77_v33, %v75_v37  ;;  %v51_v43 = vsel %vm50_vm3, %v33_v13, %v49_v35  ;;  %v58_v44 = vmul.f32 0.5, %v57_v36  ;;  %v327_v21 = vor.u32 %v352_v11, %v324_v12 }
  0x8e   :  { %v93_v48 = vmul.f32 0.125, %v78_v42  ;;  %v54_v49 = vsel %vm52_vm4, %v53_v38, %v51_v43  ;;  %v83_v50 = vsub.f32 1.5, %v82_v39  ;;  %v366_v43 = vld [vmem:[%s577_s1] ss:$0 sm:$0xff]  ;;  %vm171_vm2 = vcmask 519168  }
  0x8f   :  { %v91_v52 = vmul.f32 0.125, %v54_v49  ;;  %v59_v53 = vsub.f32 1.5, %v58_v44  ;;  %276 = vmatpush.bf16.msra.mxu1 %v327_v21  ;;  %364 = vmatpush.bf16.msra.mxu3 %v327_v21 }
  0x90   :  { %v460_v54 = vadd.f32 1e-05, %v93_v48  ;;  %v84_v55 = vmul.f32 %v372_v25, %v83_v50  ;;  %v316_v25 = vld [vmem:[%s578_s2 + $0x8] sm:$0xf0] }
  0x91   :  { %v468_v58 = vadd.f32 1e-05, %v91_v52  ;;  %v60_v59 = vmul.f32 %v374_v27, %v59_v53 }
  0x92   :  { %375 = vrcp.f32 %v460_v54  ;;  %v85_v63 = vmul.f32 %v84_v55, %v440_v17  ;;  %v139_v33 = vand.u32 2147483647, %v460_v54  ;;  %v141_v34 = vand.u32 2147483648, %v460_v54 }
  0x93   :  { %377 = vrcp.f32 %v468_v58  ;;  %v61_v3 = vmul.f32 %v60_v59, %v442_v18  ;;  %v111_v37 = vand.u32 2147483648, %v468_v58  ;;  %v109_v39 = vand.u32 2147483647, %v468_v58 }
  0x94   :  { %v87_v13 = vsel %vm86_vm5, %v440_v17, %v85_v63  ;;  %vm135_vm11 = vweird.f32 %v460_v54  ;;  %v142_v41 = vor.u32 1.1754944e-38, %v141_v34  ;;  %vm105_vm13 = vweird.f32 %v468_v58 }
  0x95   :  { %v63_v14 = vsel %vm62_vm6, %v442_v18, %v61_v3  ;;  %v90_v19 = vsel %vm88_vm7, %v89_v2, %v87_v13  ;;  %v350_v18 = vld [vmem:[%s578_s2 + $0x4] sm:$0xf]  ;;  %vm140_vm14 = vcmp.eq.f32.partialorder %v139_v33, 8.507059e+37  ;;  %v112_v45 = vor.u32 1.1754944e-38, %v111_v37 }
  0x96   :  { %v66_v20 = vsel %vm64_vm8, %v65_v8, %v63_v14  ;;  %v94_v23 = vmul.f32 0.125, %v90_v19  ;;  %v319_v32 = vor.u32 %v350_v18, %v316_v25  ;;  %vm110_vm1 = vcmp.eq.f32.partialorder %v109_v39, 8.507059e+37 }
  0x97   :  { %v92_v17 = vmul.f32 0.125, %v66_v20 }
  0x98   :  { %v376_v22 = vpop.eup %375  ;;  %v514_v29 = vadd.f32 1e-05, %v94_v23  ;;  %277 = vmatpush.bf16.msra.mxu1 %v319_v32  ;;  %365 = vmatpush.bf16.msra.mxu3 %v319_v32 }
  0x99   :  { %v378_v26 = vpop.eup %377  ;;  %v131_v27 = vmul.f32 %v376_v22, %v460_v54  ;;  %v516_v30 = vadd.f32 1e-05, %v92_v17  ;;  %vm136_vm9 = vweird.f32 %v376_v22 }
  0x9a   :  { %v101_v28 = vmul.f32 %v378_v26, %v468_v58  ;;  %379 = vrcp.f32 %v514_v29  ;;  %vm106_vm10 = vweird.f32 %v378_v26  ;;  %vm137_vm12 = vmor %vm135_vm11, %vm136_vm9  ;;  %v154_v58 = vand.u32 2147483647, %v514_v29 }
  0x9b   :  { %v132_v31 = vsub.f32 1.0, %v131_v27  ;;  %381 = vrcp.f32 %v516_v30  ;;  %vm107_vm15 = vmor %vm105_vm13, %vm106_vm10  ;;  %v156_v59 = vand.u32 2147483648, %v514_v29  ;;  %vm150_vm5 = vweird.f32 %v514_v29 }
  0x9c   :  { %v102_v35 = vsub.f32 1.0, %v101_v28  ;;  %vm120_vm7 = vweird.f32 %v516_v30  ;;  %vm155_vm8 = vcmp.eq.f32.partialorder %v154_v58, 8.507059e+37  ;;  %vm293_vm11 = vcmask 1043456  }
  0x9d   :  { %v133_v36 = vmul.f32 %v376_v22, %v132_v31  ;;  %v157_v6 = vor.u32 1.1754944e-38, %v156_v59 }
  0x9e   :  { %v103_v38 = vmul.f32 %v378_v26, %v102_v35 }
  0x9f   :  { %v134_v40 = vadd.f32 %v376_v22, %v133_v36 }
  0xa0   :  { %v104_v42 = vadd.f32 %v378_v26, %v103_v38  ;;  %v380_v46 = vpop.eup %379 }
  0xa1   :  { %v138_v44 = vsel %vm137_vm12, %v376_v22, %v134_v40  ;;  %v382_v49 = vpop.eup %381  ;;  %v146_v52 = vmul.f32 %v380_v46, %v514_v29  ;;  %vm151_vm3 = vweird.f32 %v380_v46  ;;  %vm294_vm12 = vcmask 523268  }
  0xa2   :  { %v143_v47 = vsel %vm140_vm14, %v142_v41, %v138_v44  ;;  %v108_v48 = vsel %vm107_vm15, %v378_v26, %v104_v42  ;;  %v116_v54 = vmul.f32 %v382_v49, %v516_v30  ;;  %vm121_vm4 = vweird.f32 %v382_v49  ;;  %vm152_vm6 = vmor %vm150_vm5, %vm151_vm3 }
  0xa3   :  { %v144_v50 = vmul.f32 %v143_v47, %v411_v0  ;;  %v113_v51 = vsel %vm110_vm1, %v112_v45, %v108_v48  ;;  %v147_v56 = vsub.f32 1.0, %v146_v52  ;;  %v126_v0 = vand.u32 2147483648, %v516_v30  ;;  %vm122_vm9 = vmor %vm120_vm7, %vm121_vm4 }
  0xa4   :  { %v114_v53 = vmul.f32 %v113_v51, %v416_v1  ;;  %v117_v60 = vsub.f32 1.0, %v116_v54  ;;  %v124_v1 = vand.u32 2147483647, %v516_v30  ;;  %vm552_vm13 = vmor %vm294_vm12, %vm293_vm11 }
  0xa5   :  { %v165_v55 = vmul.f32 %v366_v43, %v144_v50  ;;  %v148_v62 = vmul.f32 %v380_v46, %v147_v56  ;;  %v127_v9 = vor.u32 1.1754944e-38, %v126_v0 }
  0xa6   :  { %v163_v57 = vmul.f32 %v366_v43, %v114_v53  ;;  %v118_v2 = vmul.f32 %v382_v49, %v117_v60  ;;  %vm125_vm10 = vcmp.eq.f32.partialorder %v124_v1, 8.507059e+37 }
  0xa7   :  { %v169_v61 = vpack.c.bf16 %v165_v55, %v165_v55  ;;  %v149_v3 = vadd.f32 %v380_v46, %v148_v62 }
  0xa8   :  { %v167_v63 = vpack.c.bf16 %v163_v57, %v163_v57  ;;  %v119_v7 = vadd.f32 %v382_v49, %v118_v2 }
  0xa9   :  { %174 = vst.msk [vmem:[#allocation2 + $0x8] sm:$0xf] %vm171_vm2, %v169_v61  ;;  %v153_v8 = vsel %vm152_vm6, %v380_v46, %v149_v3 }
  0xaa   :  { %172 = vst.msk [vmem:[#allocation2] sm:$0xf] %vm171_vm2, %v167_v63  ;;  %v158_v10 = vsel %vm155_vm8, %v157_v6, %v153_v8  ;;  %v123_v11 = vsel %vm122_vm9, %v382_v49, %v119_v7 }
  0xab   :  { %v159_v12 = vmul.f32 %v158_v10, %v425_v4  ;;  %v128_v13 = vsel %vm125_vm10, %v127_v9, %v123_v11  ;;  %v188_v4 = vld [vmem:[%s579_s3] sm:$0x3] }
  0xac   :  { %v129_v14 = vmul.f32 %v128_v13, %v430_v5  ;;  %v190_v5 = vperm.slane %v188_v4, 0  ;;  %v191_v23 = vperm.slane %v188_v4, 1 }
  0xad   :  { %v166_v15 = vmul.f32 %v366_v43, %v159_v12 }
  0xae   :  { %v164_v16 = vmul.f32 %v366_v43, %v129_v14 }
  0xaf   :  { %v170_v19 = vpack.c.bf16 %v166_v15, %v166_v15 }
  0xb0   :  { %v168_v20 = vpack.c.bf16 %v164_v16, %v164_v16 }
  0xb1   :  { %175 = vst.msk [vmem:[#allocation2 + $0xc] sm:$0xf] %vm171_vm2, %v170_v19 }
  0xb2   :  { %173 = vst.msk [vmem:[#allocation2 + $0x4] sm:$0xf] %vm171_vm2, %v168_v20 }
  0xb8   :  { %v349_v21 = vld [vmem:[#allocation2 + $0x8] sm:$0xff] }
  0xb9   :  { %v348_v22 = vld [vmem:[#allocation2] sm:$0xff]  ;;  %345 = vmatmul.msk.bf16.vlgmr.msra.gmra.mxu2 %vm30_vm0, %v349_v21  ;;  %347 = vmatmul.msk.bf16.vlgmr.msra.gmra.mxu3 %vm30_vm0, %v349_v21 }
  0xba   :  { %344 = vmatmul.msk.bf16.vlgmr.msra.gmra.mxu0 %vm30_vm0, %v348_v22  ;;  %346 = vmatmul.msk.bf16.vlgmr.msra.gmra.mxu1 %vm30_vm0, %v348_v22 }
 0x137   :  { %v260_v17 = vpop.f32.mrf.mxu0  ;;  %v279_v24 = vpop.f32.mrf.mxu1 }
 0x138   :  { %v261_v18 = vadd.f32 %v260_v17, %v190_v5  ;;  %v280_v25 = vadd.f32 %v279_v24, %v191_v23 }
 0x13a   :  { %v289_v27 = vpack.c.bf16 %v280_v25, %v261_v18 }
 0x13c   :  { %296 = vst.msk [vmem:[%s580_s4] sm:$0xff] %vm552_vm13, %v289_v27  ;;  %v265_v28 = vpop.f32.mrf.mxu2  ;;  %v284_v29 = vpop.f32.mrf.mxu3 }
 0x13d   :  { %v266_v30 = vadd.f32 %v265_v28, %v190_v5  ;;  %v285_v31 = vadd.f32 %v284_v29, %v191_v23 }
 0x13f   :  { %v291_v32 = vpack.c.bf16 %v285_v31, %v266_v30  ;;  %v262_v33 = vpop.f32.mrf.mxu0  ;;  %v281_v34 = vpop.f32.mrf.mxu1 }
 0x140   :  { %v263_v35 = vadd.f32 %v262_v33, %v190_v5  ;;  %v282_v36 = vadd.f32 %v281_v34, %v191_v23 }
 0x141   :  { %298 = vst.msk [vmem:[%s580_s4 + $0x10] sm:$0xff] %vm552_vm13, %v291_v32 }
 0x142   :  { %v290_v37 = vpack.c.bf16 %v282_v36, %v263_v35 }
 0x144   :  { %297 = vst.msk [vmem:[%s580_s4 + $0x8] sm:$0xff] %vm552_vm13, %v290_v37  ;;  %v267_v38 = vpop.f32.mrf.mxu2  ;;  %v286_v39 = vpop.f32.mrf.mxu3 }
 0x145   :  { %v268_v40 = vadd.f32 %v267_v38, %v190_v5  ;;  %v287_v41 = vadd.f32 %v286_v39, %v191_v23 }
 0x147   :  { %v292_v42 = vpack.c.bf16 %v287_v41, %v268_v40 }
 0x149   :  { %299 = vst.msk [vmem:[%s580_s4 + $0x18] sm:$0xff] %vm552_vm13, %v292_v42 }

// kernel: gpt2_forward.13
= control target key start
LH: loop header
LB: loop body
LE: loop exit
PB: predicated region body
PF: predicated region fallthrough
CT: control target
= control target key end

     0   :  { %vm68_vm0 = vcmask 523264   ;;  %s223_s1 = inlined_call_operand.vmem [shape: bf16[64,64], index: 1, kind: input, shape index: {}]   ;;  %s224_s2 = inlined_call_operand.vmem [shape: f32[1,64], index: 2, kind: input, shape index: {}]   ;;  %s225_s0 = inlined_call_operand.vmem [shape: bf16[32,64], index: 0, kind: input, shape index: {}]   ;;  %s226_s3 = inlined_call_operand.vmem [shape: f32[32,64], index: 3, kind: input, shape index: {}]   ;;  %s227_s4 = inlined_call_operand.vmem [shape: f32[32,64], index: 4, kind: output, shape index: {}]  }
   0x1   :  { %v141_v0 = vld [vmem:[%s223_s1 + $0x18] sm:$0xff]  ;;  %v140_v1 = vld [vmem:[%s223_s1 + $0x10] sm:$0xff]  ;;  %v139_v2 = vld [vmem:[%s223_s1 + $0x8] sm:$0xff] }
   0x2   :  { %79 = vmatpush.bf16.msra.mxu0 %v141_v0  ;;  %142 = vmatpush.bf16.msra.mxu1 %v141_v0  ;;  %v138_v3 = vld [vmem:[%s223_s1] sm:$0xff]  ;;  %v137_v5 = vld [vmem:[%s225_s0 + $0x8] sm:$0xff]  ;;  %v96_v10 = vld [vmem:[%s226_s3 + $0x10] sm:$0xff] }
   0x3   :  { %v136_v4 = vld [vmem:[%s225_s0] sm:$0xff]  ;;  %v95_v16 = vld [vmem:[%s226_s3 + $0x8] sm:$0xff]  ;;  %v97_v18 = vld [vmem:[%s226_s3 + $0x18] sm:$0xff] }
   0x4   :  { %v146_v6 = vld [vmem:[%s224_s2] ss:$0 sm:$0xff] }
   0x5   :  { %v94_v8 = vld [vmem:[%s226_s3] sm:$0xff] }
   0x6   :  { %80 = vmatpush.bf16.msra.mxu0 %v140_v1  ;;  %143 = vmatpush.bf16.msra.mxu1 %v140_v1 }
   0xa   :  { %81 = vmatpush.bf16.msra.mxu0 %v139_v2  ;;  %144 = vmatpush.bf16.msra.mxu1 %v139_v2 }
   0xe   :  { %82 = vmatpush.bf16.msra.mxu0 %v138_v3  ;;  %145 = vmatpush.bf16.msra.mxu1 %v138_v3 }
  0x11   :  { %134 = vmatmul.msk.bf16.vlgmr.msra.gmra.mxu0 %vm68_vm0, %v136_v4  ;;  %135 = vmatmul.msk.bf16.vlgmr.msra.gmra.mxu1 %vm68_vm0, %v137_v5 }
  0x8e   :  { %v84_v7 = vpop.f32.mrf.mxu0  ;;  %v89_v9 = vpop.f32.mrf.mxu1 }
  0x8f   :  { %v85_v11 = vadd.f32 %v146_v6, %v84_v7  ;;  %v90_v12 = vadd.f32 %v146_v6, %v89_v9 }
  0x91   :  { %v98_v13 = vadd.f32 %v94_v8, %v85_v11  ;;  %v100_v14 = vadd.f32 %v96_v10, %v90_v12 }
  0x93   :  { %102 = vst.msk [vmem:[%s227_s4] sm:$0xff] %vm68_vm0, %v98_v13 }
  0x94   :  { %104 = vst.msk [vmem:[%s227_s4 + $0x10] sm:$0xff] %vm68_vm0, %v100_v14 }
  0x96   :  { %v86_v15 = vpop.f32.mrf.mxu0  ;;  %v91_v17 = vpop.f32.mrf.mxu1 }
  0x97   :  { %v87_v19 = vadd.f32 %v146_v6, %v86_v15  ;;  %v92_v20 = vadd.f32 %v146_v6, %v91_v17 }
  0x99   :  { %v99_v21 = vadd.f32 %v95_v16, %v87_v19  ;;  %v101_v22 = vadd.f32 %v97_v18, %v92_v20 }
  0x9b   :  { %103 = vst.msk [vmem:[%s227_s4 + $0x8] sm:$0xff] %vm68_vm0, %v99_v21 }
  0x9c   :  { %105 = vst.msk [vmem:[%s227_s4 + $0x18] sm:$0xff] %vm68_vm0, %v101_v22 }

// kernel: gpt2_forward.14
= control target key start
LH: loop header
LB: loop body
LE: loop exit
PB: predicated region body
PF: predicated region fallthrough
CT: control target
= control target key end

     0   :  { %vm30_vm0 = vcmask 523264   ;;  %s670_s0 = inlined_call_operand.vmem [shape: f32[32,64], index: 0, kind: input, shape index: {}]   ;;  %s671_s1 = inlined_call_operand.vmem [shape: f32[1,64], index: 1, kind: input, shape index: {}]   ;;  %s672_s2 = inlined_call_operand.vmem [shape: bf16[64,256], index: 2, kind: input, shape index: {}]   ;;  %s673_s3 = inlined_call_operand.vmem [shape: f32[1,256], index: 3, kind: input, shape index: {}]   ;;  %s674_s4 = inlined_call_operand.vmem [shape: bf16[32,256], index: 4, kind: output, shape index: {}]  }
   0x1   :  { %v496_v0 = vld [vmem:[%s670_s0 + $0x10] sm:$0xff]  ;;  %v501_v1 = vld [vmem:[%s670_s0] sm:$0xff]  ;;  %v510_v4 = vld [vmem:[%s670_s0 + $0x18] sm:$0xff] }
   0x2   :  { %v28_v2 = vmul.f32 %v496_v0, %v496_v0  ;;  %v26_v3 = vmul.f32 %v501_v1, %v501_v1  ;;  %v515_v5 = vld [vmem:[%s670_s0 + $0x8] sm:$0xff]  ;;  %v29_v8 = vmul.f32 %v510_v4, %v510_v4  ;;  %v407_v40 = vld [vmem:[%s672_s2 + $0x30] sm:$0xf]  ;;  %v426_v41 = vld [vmem:[%s672_s2 + $0x34] sm:$0xf0] }
   0x3   :  { %v27_v9 = vmul.f32 %v515_v5, %v515_v5  ;;  %v408_v45 = vor.u32 %v426_v41, %v407_v40  ;;  %v425_v46 = vld [vmem:[%s672_s2 + $0x34] sm:$0xf]  ;;  %v409_v47 = vld [vmem:[%s672_s2 + $0x38] sm:$0xf0]  ;;  %v399_v56 = vld [vmem:[%s672_s2 + $0x20] sm:$0xf] }
   0x4   :  { %v37_v6 = vsel %vm30_vm0, %v28_v2, 0.0  ;;  %v31_v7 = vsel %vm30_vm0, %v26_v3, 0.0  ;;  %v40_v10 = vsel %vm30_vm0, %v29_v8, 0.0  ;;  %v412_v51 = vor.u32 %v425_v46, %v409_v47  ;;  %v424_v57 = vld [vmem:[%s672_s2 + $0x24] sm:$0xf0] }
   0x5   :  { %38 = vadd.xlane.f32.xlu0 %v37_v6  ;;  %32 = vadd.xlane.f32.xlu1 %v31_v7  ;;  %v34_v11 = vsel %vm30_vm0, %v27_v9, 0.0  ;;  %v400_v60 = vor.u32 %v424_v57, %v399_v56  ;;  %v423_v61 = vld [vmem:[%s672_s2 + $0x24] sm:$0xf]  ;;  %v401_v62 = vld [vmem:[%s672_s2 + $0x28] sm:$0xf0] }
   0x6   :  { %255 = vmatpush.bf16.msra.mxu0 %v408_v45  ;;  %427 = vmatpush.bf16.msra.mxu2 %v408_v45  ;;  %v391_v6 = vld [vmem:[%s672_s2 + $0x10] sm:$0xf]  ;;  %v422_v7 = vld [vmem:[%s672_s2 + $0x14] sm:$0xf0]  ;;  %v404_v9 = vor.u32 %v423_v61, %v401_v62 }
   0x7   :  { %274 = vmatpush.bf16.msra.mxu1 %v412_v51  ;;  %431 = vmatpush.bf16.msra.mxu3 %v412_v51 }
   0xa   :  { %256 = vmatpush.bf16.msra.mxu0 %v400_v60  ;;  %428 = vmatpush.bf16.msra.mxu2 %v400_v60 }
   0xb   :  { %275 = vmatpush.bf16.msra.mxu1 %v404_v9  ;;  %432 = vmatpush.bf16.msra.mxu3 %v404_v9 }
   0xd   :  { %41 = vadd.xlane.f32.xlu0 %v40_v10  ;;  %35 = vadd.xlane.f32.xlu1 %v34_v11  ;;  %v392_v10 = vor.u32 %v422_v7, %v391_v6  ;;  %v421_v11 = vld [vmem:[%s672_s2 + $0x14] sm:$0xf] }
   0xf   :  { %257 = vmatpush.bf16.msra.mxu0 %v392_v10  ;;  %429 = vmatpush.bf16.msra.mxu2 %v392_v10 }
  0x78   :  { %v39_v12 = vpop.xlane.xlu0 %38  ;;  %v33_v13 = vpop.xlane.xlu1 %32 }
  0x79   :  { %436 = vrsqrt.f32 %v39_v12  ;;  %vm74_vm1 = vcmp.eq.f32.partialorder %v39_v12, inf  ;;  %vm76_vm2 = vcmp.eq.f32.partialorder %v39_v12, 0.0  ;;  %v77_v33 = vand.u32 2147483648, %v39_v12 }
  0x7a   :  { %438 = vrsqrt.f32 %v33_v13  ;;  %vm50_vm3 = vcmp.eq.f32.partialorder %v33_v13, inf  ;;  %vm52_vm4 = vcmp.eq.f32.partialorder %v33_v13, 0.0  ;;  %v53_v38 = vand.u32 2147483648, %v33_v13 }
  0x7f   :  { %v437_v14 = vpop.eup %436 }
  0x80   :  { %v439_v15 = vpop.eup %438  ;;  %v68_v16 = vmul.f32 %v437_v14, %v39_v12  ;;  %v525_v17 = vpop.xlane.xlu0 %41 }
  0x81   :  { %v527_v18 = vpop.xlane.xlu1 %35  ;;  %v44_v19 = vmul.f32 %v439_v15, %v33_v13  ;;  %440 = vrsqrt.f32 %v525_v17  ;;  %vm86_vm5 = vcmp.eq.f32.partialorder %v525_v17, inf  ;;  %v89_v2 = vand.u32 2147483648, %v525_v17 }
  0x82   :  { %v69_v20 = vmul.f32 %v437_v14, %v68_v16  ;;  %442 = vrsqrt.f32 %v527_v18  ;;  %vm62_vm6 = vcmp.eq.f32.partialorder %v527_v18, inf  ;;  %v65_v8 = vand.u32 2147483648, %v527_v18  ;;  %v420_v16 = vld [vmem:[%s672_s2 + $0x4] sm:$0xf0] }
  0x83   :  { %v45_v21 = vmul.f32 %v439_v15, %v44_v19  ;;  %vm88_vm7 = vcmp.eq.f32.partialorder %v525_v17, 0.0  ;;  %vm64_vm8 = vcmp.eq.f32.partialorder %v527_v18, 0.0 }
  0x84   :  { %v70_v22 = vmul.f32 0.5, %v69_v20 }
  0x85   :  { %v46_v23 = vmul.f32 0.5, %v45_v21 }
  0x86   :  { %v71_v24 = vsub.f32 1.5, %v70_v22 }
  0x87   :  { %v441_v25 = vpop.eup %440  ;;  %v47_v26 = vsub.f32 1.5, %v46_v23 }
  0x88   :  { %v443_v27 = vpop.eup %442  ;;  %v72_v28 = vmul.f32 %v437_v14, %v71_v24  ;;  %v80_v29 = vmul.f32 %v441_v25, %v525_v17 }
  0x89   :  { %v48_v30 = vmul.f32 %v439_v15, %v47_v26  ;;  %v56_v31 = vmul.f32 %v443_v27, %v527_v18  ;;  %v383_v15 = vld [vmem:[%s672_s2] sm:$0xf] }
  0x8a   :  { %v73_v32 = vmul.f32 %v72_v28, %v39_v12  ;;  %v81_v34 = vmul.f32 %v441_v25, %v80_v29  ;;  %v384_v24 = vor.u32 %v420_v16, %v383_v15 }
  0x8b   :  { %v49_v35 = vmul.f32 %v48_v30, %v33_v13  ;;  %v57_v36 = vmul.f32 %v443_v27, %v56_v31 }
  0x8c   :  { %v75_v37 = vsel %vm74_vm1, %v39_v12, %v73_v32  ;;  %v82_v39 = vmul.f32 0.5, %v81_v34  ;;  %v393_v12 = vld [vmem:[%s672_s2 + $0x18] sm:$0xf0]  ;;  %258 = vmatpush.bf16.msra.mxu0 %v384_v24  ;;  %430 = vmatpush.bf16.msra.mxu2 %v384_v24 }
  0x8d   :  { %v78_v42 = vsel %vm76_vm2, %v77_v33, %v75_v37  ;;  %v51_v43 = vsel %vm50_vm3, %v33_v13, %v49_v35  ;;  %v58_v44 = vmul.f32 0.5, %v57_v36  ;;  %v396_v21 = vor.u32 %v421_v11, %v393_v12 }
  0x8e   :  { %v93_v48 = vmul.f32 0.125, %v78_v42  ;;  %v54_v49 = vsel %vm52_vm4, %v53_v38, %v51_v43  ;;  %v83_v50 = vsub.f32 1.5, %v82_v39  ;;  %v435_v43 = vld [vmem:[%s671_s1] ss:$0 sm:$0xff]  ;;  %vm171_vm2 = vcmask 519168  }
  0x8f   :  { %v91_v52 = vmul.f32 0.125, %v54_v49  ;;  %v59_v53 = vsub.f32 1.5, %v58_v44  ;;  %276 = vmatpush.bf16.msra.mxu1 %v396_v21  ;;  %433 = vmatpush.bf16.msra.mxu3 %v396_v21 }
  0x90   :  { %v545_v54 = vadd.f32 1e-05, %v93_v48  ;;  %v84_v55 = vmul.f32 %v441_v25, %v83_v50  ;;  %v385_v25 = vld [vmem:[%s672_s2 + $0x8] sm:$0xf0] }
  0x91   :  { %v553_v58 = vadd.f32 1e-05, %v91_v52  ;;  %v60_v59 = vmul.f32 %v443_v27, %v59_v53 }
  0x92   :  { %444 = vrcp.f32 %v545_v54  ;;  %v85_v63 = vmul.f32 %v84_v55, %v525_v17  ;;  %v139_v33 = vand.u32 2147483647, %v545_v54  ;;  %v141_v34 = vand.u32 2147483648, %v545_v54 }
  0x93   :  { %446 = vrcp.f32 %v553_v58  ;;  %v61_v3 = vmul.f32 %v60_v59, %v527_v18  ;;  %v111_v37 = vand.u32 2147483648, %v553_v58  ;;  %v109_v39 = vand.u32 2147483647, %v553_v58 }
  0x94   :  { %v87_v13 = vsel %vm86_vm5, %v525_v17, %v85_v63  ;;  %vm135_vm11 = vweird.f32 %v545_v54  ;;  %v142_v41 = vor.u32 1.1754944e-38, %v141_v34  ;;  %vm105_vm13 = vweird.f32 %v553_v58 }
  0x95   :  { %v63_v14 = vsel %vm62_vm6, %v527_v18, %v61_v3  ;;  %v90_v19 = vsel %vm88_vm7, %v89_v2, %v87_v13  ;;  %v419_v18 = vld [vmem:[%s672_s2 + $0x4] sm:$0xf]  ;;  %vm140_vm14 = vcmp.eq.f32.partialorder %v139_v33, 8.507059e+37  ;;  %v112_v45 = vor.u32 1.1754944e-38, %v111_v37 }
  0x96   :  { %v66_v20 = vsel %vm64_vm8, %v65_v8, %v63_v14  ;;  %v94_v23 = vmul.f32 0.125, %v90_v19  ;;  %v388_v32 = vor.u32 %v419_v18, %v385_v25  ;;  %vm110_vm1 = vcmp.eq.f32.partialorder %v109_v39, 8.507059e+37 }
  0x97   :  { %v92_v17 = vmul.f32 0.125, %v66_v20 }
  0x98   :  { %v445_v22 = vpop.eup %444  ;;  %v599_v29 = vadd.f32 1e-05, %v94_v23  ;;  %277 = vmatpush.bf16.msra.mxu1 %v388_v32  ;;  %434 = vmatpush.bf16.msra.mxu3 %v388_v32 }
  0x99   :  { %v447_v26 = vpop.eup %446  ;;  %v131_v27 = vmul.f32 %v445_v22, %v545_v54  ;;  %v601_v30 = vadd.f32 1e-05, %v92_v17  ;;  %vm136_vm9 = vweird.f32 %v445_v22 }
  0x9a   :  { %v101_v28 = vmul.f32 %v447_v26, %v553_v58  ;;  %448 = vrcp.f32 %v599_v29  ;;  %vm106_vm10 = vweird.f32 %v447_v26  ;;  %vm137_vm12 = vmor %vm135_vm11, %vm136_vm9  ;;  %v154_v58 = vand.u32 2147483647, %v599_v29 }
  0x9b   :  { %v132_v31 = vsub.f32 1.0, %v131_v27  ;;  %450 = vrcp.f32 %v601_v30  ;;  %vm107_vm15 = vmor %vm105_vm13, %vm106_vm10  ;;  %v156_v59 = vand.u32 2147483648, %v599_v29  ;;  %vm150_vm5 = vweird.f32 %v599_v29 }
  0x9c   :  { %v102_v35 = vsub.f32 1.0, %v101_v28  ;;  %vm120_vm7 = vweird.f32 %v601_v30  ;;  %vm155_vm8 = vcmp.eq.f32.partialorder %v154_v58, 8.507059e+37 }
  0x9d   :  { %v133_v36 = vmul.f32 %v445_v22, %v132_v31  ;;  %v157_v6 = vor.u32 1.1754944e-38, %v156_v59 }
  0x9e   :  { %v103_v38 = vmul.f32 %v447_v26, %v102_v35 }
  0x9f   :  { %v134_v40 = vadd.f32 %v445_v22, %v133_v36 }
  0xa0   :  { %v104_v42 = vadd.f32 %v447_v26, %v103_v38  ;;  %v449_v46 = vpop.eup %448 }
  0xa1   :  { %v138_v44 = vsel %vm137_vm12, %v445_v22, %v134_v40  ;;  %v451_v49 = vpop.eup %450  ;;  %v146_v52 = vmul.f32 %v449_v46, %v599_v29  ;;  %vm151_vm3 = vweird.f32 %v449_v46 }
  0xa2   :  { %v143_v47 = vsel %vm140_vm14, %v142_v41, %v138_v44  ;;  %v108_v48 = vsel %vm107_vm15, %v447_v26, %v104_v42  ;;  %v116_v54 = vmul.f32 %v451_v49, %v601_v30  ;;  %vm121_vm4 = vweird.f32 %v451_v49  ;;  %vm152_vm6 = vmor %vm150_vm5, %vm151_vm3 }
  0xa3   :  { %v144_v50 = vmul.f32 %v143_v47, %v496_v0  ;;  %v113_v51 = vsel %vm110_vm1, %v112_v45, %v108_v48  ;;  %v147_v56 = vsub.f32 1.0, %v146_v52  ;;  %v126_v0 = vand.u32 2147483648, %v601_v30  ;;  %vm122_vm9 = vmor %vm120_vm7, %vm121_vm4 }
  0xa4   :  { %v114_v53 = vmul.f32 %v113_v51, %v501_v1  ;;  %v117_v60 = vsub.f32 1.0, %v116_v54  ;;  %v124_v1 = vand.u32 2147483647, %v601_v30 }
  0xa5   :  { %v165_v55 = vmul.f32 %v435_v43, %v144_v50  ;;  %v148_v62 = vmul.f32 %v449_v46, %v147_v56  ;;  %v127_v9 = vor.u32 1.1754944e-38, %v126_v0 }
  0xa6   :  { %v163_v57 = vmul.f32 %v435_v43, %v114_v53  ;;  %v118_v2 = vmul.f32 %v451_v49, %v117_v60  ;;  %vm125_vm10 = vcmp.eq.f32.partialorder %v124_v1, 8.507059e+37 }
  0xa7   :  { %v169_v61 = vpack.c.bf16 %v165_v55, %v165_v55  ;;  %v149_v3 = vadd.f32 %v449_v46, %v148_v62 }
  0xa8   :  { %v167_v63 = vpack.c.bf16 %v163_v57, %v163_v57  ;;  %v119_v7 = vadd.f32 %v451_v49, %v118_v2 }
  0xa9   :  { %174 = vst.msk [vmem:[#allocation2 + $0x8] sm:$0xf] %vm171_vm2, %v169_v61  ;;  %v153_v8 = vsel %vm152_vm6, %v449_v46, %v149_v3 }
  0xaa   :  { %172 = vst.msk [vmem:[#allocation2] sm:$0xf] %vm171_vm2, %v167_v63  ;;  %v158_v10 = vsel %vm155_vm8, %v157_v6, %v153_v8  ;;  %v123_v11 = vsel %vm122_vm9, %v451_v49, %v119_v7 }
  0xab   :  { %v159_v12 = vmul.f32 %v158_v10, %v510_v4  ;;  %v128_v13 = vsel %vm125_vm10, %v127_v9, %v123_v11  ;;  %v188_v4 = vld [vmem:[%s673_s3] sm:$0x3] }
  0xac   :  { %v129_v14 = vmul.f32 %v128_v13, %v515_v5  ;;  %v190_v5 = vperm.slane %v188_v4, 0  ;;  %v191_v23 = vperm.slane %v188_v4, 1 }
  0xad   :  { %v166_v15 = vmul.f32 %v435_v43, %v159_v12 }
  0xae   :  { %v164_v16 = vmul.f32 %v435_v43, %v129_v14 }
  0xaf   :  { %v170_v19 = vpack.c.bf16 %v166_v15, %v166_v15 }
  0xb0   :  { %v168_v20 = vpack.c.bf16 %v164_v16, %v164_v16 }
  0xb1   :  { %175 = vst.msk [vmem:[#allocation2 + $0xc] sm:$0xf] %vm171_vm2, %v170_v19 }
  0xb2   :  { %173 = vst.msk [vmem:[#allocation2 + $0x4] sm:$0xf] %vm171_vm2, %v168_v20 }
  0xb8   :  { %v418_v21 = vld [vmem:[#allocation2 + $0x8] sm:$0xff] }
  0xb9   :  { %v417_v22 = vld [vmem:[#allocation2] sm:$0xff]  ;;  %414 = vmatmul.msk.bf16.vlgmr.msra.gmra.mxu2 %vm30_vm0, %v418_v21  ;;  %416 = vmatmul.msk.bf16.vlgmr.msra.gmra.mxu3 %vm30_vm0, %v418_v21 }
  0xba   :  { %413 = vmatmul.msk.bf16.vlgmr.msra.gmra.mxu0 %vm30_vm0, %v417_v22  ;;  %415 = vmatmul.msk.bf16.vlgmr.msra.gmra.mxu1 %vm30_vm0, %v417_v22 }
 0x137   :  { %v260_v17 = vpop.f32.mrf.mxu0  ;;  %v279_v24 = vpop.f32.mrf.mxu1 }
 0x138   :  { %v261_v18 = vadd.f32 %v260_v17, %v190_v5  ;;  %v280_v25 = vadd.f32 %v279_v24, %v191_v23 }
 0x13a   :  { %v297_v26 = vmul.f32 %v261_v18, %v261_v18  ;;  %v298_v27 = vmul.f32 %v280_v25, %v280_v25  ;;  %v289_v10 = vmul.f32 0.5, %v261_v18  ;;  %v290_v14 = vmul.f32 0.5, %v280_v25 }
 0x13c   :  { %v305_v28 = vmul.f32 %v297_v26, %v261_v18  ;;  %v306_v29 = vmul.f32 %v298_v27, %v280_v25  ;;  %v265_v30 = vpop.f32.mrf.mxu2  ;;  %v284_v31 = vpop.f32.mrf.mxu3 }
 0x13d   :  { %v266_v32 = vadd.f32 %v265_v30, %v190_v5  ;;  %v637_v33 = vadd.f32 %v284_v31, %v191_v23 }
 0x13e   :  { %v313_v34 = vmul.f32 0.044715, %v305_v28  ;;  %v314_v35 = vmul.f32 0.044715, %v306_v29 }
 0x13f   :  { %v301_v36 = vmul.f32 %v266_v32, %v266_v32  ;;  %v302_v37 = vmul.f32 %v637_v33, %v637_v33  ;;  %v262_v38 = vpop.f32.mrf.mxu0  ;;  %v281_v39 = vpop.f32.mrf.mxu1  ;;  %v293_v24 = vmul.f32 0.5, %v266_v32 }
 0x140   :  { %v321_v40 = vadd.f32 %v313_v34, %v261_v18  ;;  %v322_v41 = vadd.f32 %v314_v35, %v280_v25  ;;  %v641_v42 = vadd.f32 %v262_v38, %v190_v5  ;;  %v643_v43 = vadd.f32 %v281_v39, %v191_v23 }
 0x141   :  { %v309_v44 = vmul.f32 %v301_v36, %v266_v32  ;;  %v310_v45 = vmul.f32 %v302_v37, %v637_v33  ;;  %v294_v18 = vmul.f32 0.5, %v637_v33 }
 0x142   :  { %v329_v46 = vmul.f32 0.7978846, %v321_v40  ;;  %v330_v47 = vmul.f32 0.7978846, %v322_v41  ;;  %v299_v48 = vmul.f32 %v641_v42, %v641_v42  ;;  %v300_v51 = vmul.f32 %v643_v43, %v643_v43 }
 0x143   :  { %v317_v49 = vmul.f32 0.044715, %v309_v44  ;;  %v318_v50 = vmul.f32 0.044715, %v310_v45  ;;  %v291_v35 = vmul.f32 0.5, %v641_v42 }
 0x144   :  { %452 = vtanh.f32 %v329_v46  ;;  %v307_v52 = vmul.f32 %v299_v48, %v641_v42  ;;  %v267_v53 = vpop.f32.mrf.mxu2  ;;  %v286_v54 = vpop.f32.mrf.mxu3  ;;  %v308_v57 = vmul.f32 %v300_v51, %v643_v43 }
 0x145   :  { %454 = vtanh.f32 %v330_v47  ;;  %v325_v55 = vadd.f32 %v317_v49, %v266_v32  ;;  %v326_v56 = vadd.f32 %v318_v50, %v637_v33  ;;  %v268_v59 = vadd.f32 %v267_v53, %v190_v5 }
 0x146   :  { %v315_v58 = vmul.f32 0.044715, %v307_v52  ;;  %v287_v60 = vadd.f32 %v286_v54, %v191_v23  ;;  %v316_v0 = vmul.f32 0.044715, %v308_v57  ;;  %v292_v32 = vmul.f32 0.5, %v643_v43 }
 0x147   :  { %v333_v61 = vmul.f32 0.7978846, %v325_v55  ;;  %v334_v62 = vmul.f32 0.7978846, %v326_v56  ;;  %v303_v2 = vmul.f32 %v268_v59, %v268_v59  ;;  %v295_v45 = vmul.f32 0.5, %v268_v59 }
 0x148   :  { %v323_v63 = vadd.f32 %v315_v58, %v641_v42  ;;  %v324_v1 = vadd.f32 %v316_v0, %v643_v43  ;;  %v304_v3 = vmul.f32 %v287_v60, %v287_v60  ;;  %v296_v42 = vmul.f32 0.5, %v287_v60 }
 0x149   :  { %456 = vtanh.f32 %v333_v61  ;;  %v311_v8 = vmul.f32 %v303_v2, %v268_v59 }
 0x14a   :  { %v453_v6 = vpop.eup %452  ;;  %458 = vtanh.f32 %v334_v62  ;;  %v331_v7 = vmul.f32 0.7978846, %v323_v63  ;;  %v332_v12 = vmul.f32 0.7978846, %v324_v1  ;;  %v312_v13 = vmul.f32 %v304_v3, %v287_v60 }
 0x14b   :  { %v455_v9 = vpop.eup %454  ;;  %v345_v11 = vadd.f32 1.0, %v453_v6  ;;  %v319_v16 = vmul.f32 0.044715, %v311_v8 }
 0x14c   :  { %v346_v15 = vadd.f32 1.0, %v455_v9  ;;  %460 = vtanh.f32 %v331_v7  ;;  %v320_v20 = vmul.f32 0.044715, %v312_v13 }
 0x14d   :  { %v353_v19 = vmul.f32 %v345_v11, %v289_v10  ;;  %462 = vtanh.f32 %v332_v12  ;;  %v327_v22 = vadd.f32 %v319_v16, %v268_v59 }
 0x14e   :  { %v354_v21 = vmul.f32 %v346_v15, %v290_v14  ;;  %v328_v5 = vadd.f32 %v320_v20, %v287_v60 }
 0x14f   :  { %v457_v4 = vpop.eup %456  ;;  %v335_v27 = vmul.f32 0.7978846, %v327_v22 }
 0x150   :  { %v459_v23 = vpop.eup %458  ;;  %v361_v17 = vpack.c.bf16 %v354_v21, %v353_v19  ;;  %v349_v26 = vadd.f32 1.0, %v457_v4  ;;  %v336_v29 = vmul.f32 0.7978846, %v328_v5 }
 0x151   :  { %v350_v28 = vadd.f32 1.0, %v459_v23  ;;  %464 = vtanh.f32 %v335_v27 }
 0x152   :  { %v461_v25 = vpop.eup %460  ;;  %365 = vst [vmem:[%s674_s4] sm:$0xff] %v361_v17  ;;  %v357_v30 = vmul.f32 %v349_v26, %v293_v24  ;;  %466 = vtanh.f32 %v336_v29 }
 0x153   :  { %v463_v31 = vpop.eup %462  ;;  %v358_v34 = vmul.f32 %v350_v28, %v294_v18  ;;  %v347_v36 = vadd.f32 1.0, %v461_v25 }
 0x154   :  { %v348_v37 = vadd.f32 1.0, %v463_v31 }
 0x155   :  { %v363_v38 = vpack.c.bf16 %v358_v34, %v357_v30  ;;  %v355_v33 = vmul.f32 %v347_v36, %v291_v35 }
 0x156   :  { %v356_v39 = vmul.f32 %v348_v37, %v292_v32 }
 0x157   :  { %367 = vst [vmem:[%s674_s4 + $0x10] sm:$0xff] %v363_v38  ;;  %v465_v40 = vpop.eup %464 }
 0x158   :  { %v362_v41 = vpack.c.bf16 %v356_v39, %v355_v33  ;;  %v467_v44 = vpop.eup %466  ;;  %v351_v46 = vadd.f32 1.0, %v465_v40 }
 0x159   :  { %v352_v47 = vadd.f32 1.0, %v467_v44 }
 0x15a   :  { %366 = vst [vmem:[%s674_s4 + $0x8] sm:$0xff] %v362_v41  ;;  %v359_v43 = vmul.f32 %v351_v46, %v295_v45 }
 0x15b   :  { %v360_v48 = vmul.f32 %v352_v47, %v296_v42 }
 0x15d   :  { %v364_v49 = vpack.c.bf16 %v360_v48, %v359_v43 }
 0x15f   :  { %368 = vst [vmem:[%s674_s4 + $0x18] sm:$0xff] %v364_v49 }

// kernel: gpt2_forward.15
= control target key start
LH: loop header
LB: loop body
LE: loop exit
PB: predicated region body
PF: predicated region fallthrough
CT: control target
= control target key end

     0   :  { %vm219_vm0 = vcmask 523264   ;;  %s473_s1 = inlined_call_operand.vmem [shape: bf16[256,64], index: 1, kind: input, shape index: {}]   ;;  %s474_s2 = inlined_call_operand.vmem [shape: f32[1,64], index: 2, kind: input, shape index: {}]   ;;  %s475_s0 = inlined_call_operand.vmem [shape: bf16[32,256], index: 0, kind: input, shape index: {}]   ;;  %s476_s3 = inlined_call_operand.vmem [shape: f32[32,64], index: 3, kind: input, shape index: {}]   ;;  %s477_s4 = inlined_call_operand.vmem [shape: f32[32,64], index: 4, kind: output, shape index: {}]  }
   0x1   :  { %v319_v0 = vld [vmem:[%s473_s1 + $0x38] sm:$0xff]  ;;  %v318_v2 = vld [vmem:[%s473_s1 + $0x30] sm:$0xff]  ;;  %v317_v4 = vld [vmem:[%s473_s1 + $0x28] sm:$0xff] }
   0x2   :  { %v327_v1 = vld [vmem:[%s473_s1 + $0x78] sm:$0xff]  ;;  %173 = vmatpush.bf16.msra.mxu0 %v319_v0  ;;  %328 = vmatpush.bf16.msra.mxu2 %v319_v0  ;;  %v326_v3 = vld [vmem:[%s473_s1 + $0x70] sm:$0xff]  ;;  %v325_v5 = vld [vmem:[%s473_s1 + $0x68] sm:$0xff] }
   0x3   :  { %192 = vmatpush.bf16.msra.mxu1 %v327_v1  ;;  %336 = vmatpush.bf16.msra.mxu3 %v327_v1  ;;  %v316_v6 = vld [vmem:[%s473_s1 + $0x20] sm:$0xff]  ;;  %v315_v8 = vld [vmem:[%s473_s1 + $0x18] sm:$0xff]  ;;  %v314_v10 = vld [vmem:[%s473_s1 + $0x10] sm:$0xff] }
   0x4   :  { %v324_v7 = vld [vmem:[%s473_s1 + $0x60] sm:$0xff]  ;;  %v323_v9 = vld [vmem:[%s473_s1 + $0x58] sm:$0xff]  ;;  %v322_v11 = vld [vmem:[%s473_s1 + $0x50] sm:$0xff] }
   0x5   :  { %v313_v12 = vld [vmem:[%s473_s1 + $0x8] sm:$0xff]  ;;  %v312_v14 = vld [vmem:[%s473_s1] sm:$0xff]  ;;  %v238_v18 = vld [vmem:[%s475_s0 + $0x10] sm:$0xf] }
   0x6   :  { %174 = vmatpush.bf16.msra.mxu0 %v318_v2  ;;  %329 = vmatpush.bf16.msra.mxu2 %v318_v2  ;;  %v321_v13 = vld [vmem:[%s473_s1 + $0x48] sm:$0xff]  ;;  %v320_v15 = vld [vmem:[%s473_s1 + $0x40] sm:$0xff]  ;;  %v311_v19 = vld [vmem:[%s475_s0 + $0x14] sm:$0xf0] }
   0x7   :  { %193 = vmatpush.bf16.msra.mxu1 %v326_v3  ;;  %337 = vmatpush.bf16.msra.mxu3 %v326_v3  ;;  %v230_v16 = vld [vmem:[%s475_s0] sm:$0xf]  ;;  %v309_v17 = vld [vmem:[%s475_s0 + $0x4] sm:$0xf0]  ;;  %v308_v20 = vld [vmem:[%s475_s0 + $0x4] sm:$0xf]  ;;  %v239_v25 = vor.u32 %v311_v19, %v238_v18 }
   0x8   :  { %v232_v21 = vld [vmem:[%s475_s0 + $0x8] sm:$0xf0]  ;;  %v310_v22 = vld [vmem:[%s475_s0 + $0x14] sm:$0xf]  ;;  %v240_v23 = vld [vmem:[%s475_s0 + $0x18] sm:$0xf0]  ;;  %v231_v24 = vor.u32 %v309_v17, %v230_v16 }
   0x9   :  { %v235_v26 = vor.u32 %v308_v20, %v232_v21  ;;  %v243_v27 = vor.u32 %v310_v22, %v240_v23  ;;  %v344_v28 = vld [vmem:[%s474_s2] ss:$0 sm:$0xff]  ;;  %v213_v38 = vld [vmem:[%s476_s3 + $0x10] sm:$0xff]  ;;  %v212_v43 = vld [vmem:[%s476_s3 + $0x8] sm:$0xff] }
   0xa   :  { %175 = vmatpush.bf16.msra.mxu0 %v317_v4  ;;  %330 = vmatpush.bf16.msra.mxu2 %v317_v4  ;;  %v211_v32 = vld [vmem:[%s476_s3] sm:$0xff]  ;;  %v214_v50 = vld [vmem:[%s476_s3 + $0x18] sm:$0xff] }
   0xb   :  { %194 = vmatpush.bf16.msra.mxu1 %v325_v5  ;;  %338 = vmatpush.bf16.msra.mxu3 %v325_v5 }
   0xe   :  { %176 = vmatpush.bf16.msra.mxu0 %v316_v6  ;;  %331 = vmatpush.bf16.msra.mxu2 %v316_v6 }
   0xf   :  { %195 = vmatpush.bf16.msra.mxu1 %v324_v7  ;;  %339 = vmatpush.bf16.msra.mxu3 %v324_v7 }
  0x12   :  { %177 = vmatpush.bf16.msra.mxu0 %v315_v8  ;;  %332 = vmatpush.bf16.msra.mxu2 %v315_v8 }
  0x13   :  { %196 = vmatpush.bf16.msra.mxu1 %v323_v9  ;;  %340 = vmatpush.bf16.msra.mxu3 %v323_v9 }
  0x16   :  { %178 = vmatpush.bf16.msra.mxu0 %v314_v10  ;;  %333 = vmatpush.bf16.msra.mxu2 %v314_v10 }
  0x17   :  { %197 = vmatpush.bf16.msra.mxu1 %v322_v11  ;;  %341 = vmatpush.bf16.msra.mxu3 %v322_v11 }
  0x1a   :  { %179 = vmatpush.bf16.msra.mxu0 %v313_v12  ;;  %334 = vmatpush.bf16.msra.mxu2 %v313_v12 }
  0x1b   :  { %198 = vmatpush.bf16.msra.mxu1 %v321_v13  ;;  %342 = vmatpush.bf16.msra.mxu3 %v321_v13 }
  0x1e   :  { %180 = vmatpush.bf16.msra.mxu0 %v312_v14  ;;  %335 = vmatpush.bf16.msra.mxu2 %v312_v14 }
  0x1f   :  { %199 = vmatpush.bf16.msra.mxu1 %v320_v15  ;;  %343 = vmatpush.bf16.msra.mxu3 %v320_v15 }
  0x21   :  { %181 = vmatmul.bf16.vlgmr.msra.gmra.mxu0 %v231_v24  ;;  %186 = vmatmul.bf16.vlgmr.msra.gmra.mxu2 %v239_v25 }
  0x22   :  { %200 = vmatmul.bf16.vlgmr.msra.gmra.mxu1 %v235_v26  ;;  %205 = vmatmul.bf16.vlgmr.msra.gmra.mxu3 %v243_v27 }
  0x9e   :  { %v182_v29 = vpop.f32.mrf.mxu0 }
  0x9f   :  { %v183_v30 = vadd.f32 %v344_v28, %v182_v29  ;;  %v201_v31 = vpop.f32.mrf.mxu1 }
  0xa1   :  { %v202_v33 = vadd.f32 %v201_v31, %v183_v30 }
  0xa3   :  { %v215_v34 = vadd.f32 %v211_v32, %v202_v33 }
  0xa4   :  { %v187_v35 = vpop.f32.mrf.mxu2 }
  0xa5   :  { %220 = vst.msk [vmem:[%s477_s4] sm:$0xff] %vm219_vm0, %v215_v34  ;;  %v188_v36 = vadd.f32 %v344_v28, %v187_v35  ;;  %v206_v37 = vpop.f32.mrf.mxu3 }
  0xa6   :  { %v184_v39 = vpop.f32.mrf.mxu0 }
  0xa7   :  { %v207_v40 = vadd.f32 %v206_v37, %v188_v36  ;;  %v185_v41 = vadd.f32 %v344_v28, %v184_v39  ;;  %v203_v42 = vpop.f32.mrf.mxu1 }
  0xa9   :  { %v217_v44 = vadd.f32 %v213_v38, %v207_v40  ;;  %v204_v45 = vadd.f32 %v203_v42, %v185_v41 }
  0xab   :  { %222 = vst.msk [vmem:[%s477_s4 + $0x10] sm:$0xff] %vm219_vm0, %v217_v44  ;;  %v216_v46 = vadd.f32 %v212_v43, %v204_v45 }
  0xac   :  { %v189_v47 = vpop.f32.mrf.mxu2 }
  0xad   :  { %221 = vst.msk [vmem:[%s477_s4 + $0x8] sm:$0xff] %vm219_vm0, %v216_v46  ;;  %v190_v48 = vadd.f32 %v344_v28, %v189_v47  ;;  %v208_v49 = vpop.f32.mrf.mxu3 }
  0xaf   :  { %v209_v51 = vadd.f32 %v208_v49, %v190_v48 }
  0xb1   :  { %v218_v52 = vadd.f32 %v214_v50, %v209_v51 }
  0xb3   :  { %223 = vst.msk [vmem:[%s477_s4 + $0x18] sm:$0xff] %vm219_vm0, %v218_v52 }

// kernel: gpt2_forward.21
= control target key start
LH: loop header
LB: loop body
LE: loop exit
PB: predicated region body
PF: predicated region fallthrough
CT: control target
= control target key end

     0   :  { %vm28_vm0 = vcmask 523264   ;;  %s582_s0 = inlined_call_operand.vmem [shape: f32[32,64], index: 0, kind: input, shape index: {}]   ;;  %s583_s1 = inlined_call_operand.vmem [shape: f32[1,64], index: 1, kind: input, shape index: {}]   ;;  %s584_s2 = inlined_call_operand.vmem [shape: bf16[64,256], index: 2, kind: input, shape index: {}]   ;;  %s585_s3 = inlined_call_operand.hbm [shape: f32[32,256], index: 3, kind: output, shape index: {}]  }
   0x1   :  { %v441_v0 = vld [vmem:[%s582_s0 + $0x10] sm:$0xff]  ;;  %v446_v1 = vld [vmem:[%s582_s0] sm:$0xff]  ;;  %v455_v4 = vld [vmem:[%s582_s0 + $0x18] sm:$0xff] }
   0x2   :  { %v26_v2 = vmul.f32 %v441_v0, %v441_v0  ;;  %v24_v3 = vmul.f32 %v446_v1, %v446_v1  ;;  %v460_v5 = vld [vmem:[%s582_s0 + $0x8] sm:$0xff] }
   0x3   :  { %8 = vsyncpa [#allocation4], 0  ;;  %v27_v8 = vmul.f32 %v455_v4, %v455_v4  ;;  %v25_v9 = vmul.f32 %v460_v5, %v460_v5  ;;  %v341_v40 = vld [vmem:[%s584_s2 + $0x30] sm:$0xf]  ;;  %v360_v41 = vld [vmem:[%s584_s2 + $0x34] sm:$0xf0] }
   0x4   :  { %v35_v6 = vsel %vm28_vm0, %v26_v2, 0.0  ;;  %v29_v7 = vsel %vm28_vm0, %v24_v3, 0.0  ;;  %v342_v45 = vor.u32 %v360_v41, %v341_v40  ;;  %v359_v46 = vld [vmem:[%s584_s2 + $0x34] sm:$0xf]  ;;  %v343_v47 = vld [vmem:[%s584_s2 + $0x38] sm:$0xf0] }
   0x5   :  { %36 = vadd.xlane.f32.xlu0 %v35_v6  ;;  %30 = vadd.xlane.f32.xlu1 %v29_v7  ;;  %v38_v10 = vsel %vm28_vm0, %v27_v8, 0.0  ;;  %v32_v11 = vsel %vm28_vm0, %v25_v9, 0.0  ;;  %v346_v51 = vor.u32 %v359_v46, %v343_v47  ;;  %v333_v56 = vld [vmem:[%s584_s2 + $0x20] sm:$0xf]  ;;  %v358_v57 = vld [vmem:[%s584_s2 + $0x24] sm:$0xf0] }
   0x6   :  { %247 = vmatpush.bf16.msra.mxu0 %v342_v45  ;;  %361 = vmatpush.bf16.msra.mxu2 %v342_v45  ;;  %v334_v60 = vor.u32 %v358_v57, %v333_v56  ;;  %v357_v61 = vld [vmem:[%s584_s2 + $0x24] sm:$0xf]  ;;  %v335_v62 = vld [vmem:[%s584_s2 + $0x28] sm:$0xf0]  ;;  %v325_v6 = vld [vmem:[%s584_s2 + $0x10] sm:$0xf] }
   0x7   :  { %266 = vmatpush.bf16.msra.mxu1 %v346_v51  ;;  %365 = vmatpush.bf16.msra.mxu3 %v346_v51  ;;  %v356_v7 = vld [vmem:[%s584_s2 + $0x14] sm:$0xf0]  ;;  %v338_v9 = vor.u32 %v357_v61, %v335_v62  ;;  %s295_s27 = sshll.u32 %s585_s3, 4  ;;  %s416_s28 = smov 256   ;;  %s296_s27 = int_to_ptr.hbm [resolvable:$true] %s295_s27 }
   0x8   :  { %s417_s29 = smov 16  }
   0xa   :  { %248 = vmatpush.bf16.msra.mxu0 %v334_v60  ;;  %362 = vmatpush.bf16.msra.mxu2 %v334_v60 }
   0xb   :  { %267 = vmatpush.bf16.msra.mxu1 %v338_v9  ;;  %366 = vmatpush.bf16.msra.mxu3 %v338_v9 }
   0xd   :  { %39 = vadd.xlane.f32.xlu0 %v38_v10  ;;  %33 = vadd.xlane.f32.xlu1 %v32_v11  ;;  %v326_v10 = vor.u32 %v356_v7, %v325_v6  ;;  %v355_v11 = vld [vmem:[%s584_s2 + $0x14] sm:$0xf] }
   0xf   :  { %249 = vmatpush.bf16.msra.mxu0 %v326_v10  ;;  %363 = vmatpush.bf16.msra.mxu2 %v326_v10 }
  0x78   :  { %v37_v12 = vpop.xlane.xlu0 %36  ;;  %v31_v13 = vpop.xlane.xlu1 %30 }
  0x79   :  { %373 = vrsqrt.f32 %v37_v12  ;;  %vm72_vm1 = vcmp.eq.f32.partialorder %v37_v12, inf  ;;  %vm74_vm2 = vcmp.eq.f32.partialorder %v37_v12, 0.0  ;;  %v75_v33 = vand.u32 2147483648, %v37_v12 }
  0x7a   :  { %375 = vrsqrt.f32 %v31_v13  ;;  %vm48_vm3 = vcmp.eq.f32.partialorder %v31_v13, inf  ;;  %vm50_vm4 = vcmp.eq.f32.partialorder %v31_v13, 0.0  ;;  %v51_v38 = vand.u32 2147483648, %v31_v13 }
  0x7f   :  { %v374_v14 = vpop.eup %373 }
  0x80   :  { %v376_v15 = vpop.eup %375  ;;  %v66_v16 = vmul.f32 %v374_v14, %v37_v12  ;;  %v470_v17 = vpop.xlane.xlu0 %39 }
  0x81   :  { %v472_v18 = vpop.xlane.xlu1 %33  ;;  %v42_v19 = vmul.f32 %v376_v15, %v31_v13  ;;  %377 = vrsqrt.f32 %v470_v17  ;;  %vm84_vm5 = vcmp.eq.f32.partialorder %v470_v17, inf  ;;  %v87_v2 = vand.u32 2147483648, %v470_v17 }
  0x82   :  { %v67_v20 = vmul.f32 %v374_v14, %v66_v16  ;;  %379 = vrsqrt.f32 %v472_v18  ;;  %vm60_vm6 = vcmp.eq.f32.partialorder %v472_v18, inf  ;;  %v63_v8 = vand.u32 2147483648, %v472_v18  ;;  %v354_v16 = vld [vmem:[%s584_s2 + $0x4] sm:$0xf0] }
  0x83   :  { %v43_v21 = vmul.f32 %v376_v15, %v42_v19  ;;  %vm86_vm7 = vcmp.eq.f32.partialorder %v470_v17, 0.0  ;;  %vm62_vm8 = vcmp.eq.f32.partialorder %v472_v18, 0.0 }
  0x84   :  { %v68_v22 = vmul.f32 0.5, %v67_v20 }
  0x85   :  { %v44_v23 = vmul.f32 0.5, %v43_v21 }
  0x86   :  { %v69_v24 = vsub.f32 1.5, %v68_v22 }
  0x87   :  { %v378_v25 = vpop.eup %377  ;;  %v45_v26 = vsub.f32 1.5, %v44_v23 }
  0x88   :  { %v380_v27 = vpop.eup %379  ;;  %v70_v28 = vmul.f32 %v374_v14, %v69_v24  ;;  %v78_v29 = vmul.f32 %v378_v25, %v470_v17 }
  0x89   :  { %v46_v30 = vmul.f32 %v376_v15, %v45_v26  ;;  %v54_v31 = vmul.f32 %v380_v27, %v472_v18  ;;  %v317_v15 = vld [vmem:[%s584_s2] sm:$0xf] }
  0x8a   :  { %v71_v32 = vmul.f32 %v70_v28, %v37_v12  ;;  %v79_v34 = vmul.f32 %v378_v25, %v78_v29  ;;  %v318_v24 = vor.u32 %v354_v16, %v317_v15 }
  0x8b   :  { %v47_v35 = vmul.f32 %v46_v30, %v31_v13  ;;  %v55_v36 = vmul.f32 %v380_v27, %v54_v31 }
  0x8c   :  { %v73_v37 = vsel %vm72_vm1, %v37_v12, %v71_v32  ;;  %v80_v39 = vmul.f32 0.5, %v79_v34  ;;  %v327_v12 = vld [vmem:[%s584_s2 + $0x18] sm:$0xf0]  ;;  %250 = vmatpush.bf16.msra.mxu0 %v318_v24  ;;  %364 = vmatpush.bf16.msra.mxu2 %v318_v24 }
  0x8d   :  { %v76_v42 = vsel %vm74_vm2, %v75_v33, %v73_v37  ;;  %v49_v43 = vsel %vm48_vm3, %v31_v13, %v47_v35  ;;  %v56_v44 = vmul.f32 0.5, %v55_v36  ;;  %v330_v21 = vor.u32 %v355_v11, %v327_v12 }
  0x8e   :  { %v91_v48 = vmul.f32 0.125, %v76_v42  ;;  %v52_v49 = vsel %vm50_vm4, %v51_v38, %v49_v43  ;;  %v81_v50 = vsub.f32 1.5, %v80_v39  ;;  %v372_v43 = vld [vmem:[%s583_s1] ss:$0 sm:$0xff]  ;;  %vm169_vm2 = vcmask 519168   ;;  %s415_s1 = smov [#allocation3]  }
  0x8f   :  { %v89_v52 = vmul.f32 0.125, %v52_v49  ;;  %v57_v53 = vsub.f32 1.5, %v56_v44  ;;  %268 = vmatpush.bf16.msra.mxu1 %v330_v21  ;;  %367 = vmatpush.bf16.msra.mxu3 %v330_v21  ;;  %s293_s24 = sshll.u32 %s415_s1, 4  ;;  %s294_s24 = int_to_ptr.vmem [resolvable:$true] %s293_s24 }
  0x90   :  { %v490_v54 = vadd.f32 1e-05, %v91_v48  ;;  %v82_v55 = vmul.f32 %v378_v25, %v81_v50  ;;  %v319_v25 = vld [vmem:[%s584_s2 + $0x8] sm:$0xf0] }
  0x91   :  { %v498_v58 = vadd.f32 1e-05, %v89_v52  ;;  %v58_v59 = vmul.f32 %v380_v27, %v57_v53 }
  0x92   :  { %381 = vrcp.f32 %v490_v54  ;;  %v83_v63 = vmul.f32 %v82_v55, %v470_v17  ;;  %v137_v33 = vand.u32 2147483647, %v490_v54  ;;  %v139_v34 = vand.u32 2147483648, %v490_v54 }
  0x93   :  { %383 = vrcp.f32 %v498_v58  ;;  %v59_v3 = vmul.f32 %v58_v59, %v472_v18  ;;  %v109_v37 = vand.u32 2147483648, %v498_v58  ;;  %v107_v39 = vand.u32 2147483647, %v498_v58 }
  0x94   :  { %v85_v13 = vsel %vm84_vm5, %v470_v17, %v83_v63  ;;  %vm133_vm11 = vweird.f32 %v490_v54  ;;  %v140_v41 = vor.u32 1.1754944e-38, %v139_v34  ;;  %vm103_vm13 = vweird.f32 %v498_v58 }
  0x95   :  { %v61_v14 = vsel %vm60_vm6, %v472_v18, %v59_v3  ;;  %v88_v19 = vsel %vm86_vm7, %v87_v2, %v85_v13  ;;  %v353_v18 = vld [vmem:[%s584_s2 + $0x4] sm:$0xf]  ;;  %vm138_vm14 = vcmp.eq.f32.partialorder %v137_v33, 8.507059e+37  ;;  %v110_v45 = vor.u32 1.1754944e-38, %v109_v37 }
  0x96   :  { %v64_v20 = vsel %vm62_vm8, %v63_v8, %v61_v14  ;;  %v92_v23 = vmul.f32 0.125, %v88_v19  ;;  %v322_v32 = vor.u32 %v353_v18, %v319_v25  ;;  %vm108_vm1 = vcmp.eq.f32.partialorder %v107_v39, 8.507059e+37 }
  0x97   :  { %v90_v17 = vmul.f32 0.125, %v64_v20 }
  0x98   :  { %v382_v22 = vpop.eup %381  ;;  %v544_v29 = vadd.f32 1e-05, %v92_v23  ;;  %269 = vmatpush.bf16.msra.mxu1 %v322_v32  ;;  %368 = vmatpush.bf16.msra.mxu3 %v322_v32 }
  0x99   :  { %v384_v26 = vpop.eup %383  ;;  %v129_v27 = vmul.f32 %v382_v22, %v490_v54  ;;  %v546_v30 = vadd.f32 1e-05, %v90_v17  ;;  %vm134_vm9 = vweird.f32 %v382_v22 }
  0x9a   :  { %v99_v28 = vmul.f32 %v384_v26, %v498_v58  ;;  %385 = vrcp.f32 %v544_v29  ;;  %vm104_vm10 = vweird.f32 %v384_v26  ;;  %vm135_vm12 = vmor %vm133_vm11, %vm134_vm9  ;;  %v152_v58 = vand.u32 2147483647, %v544_v29 }
  0x9b   :  { %v130_v31 = vsub.f32 1.0, %v129_v27  ;;  %387 = vrcp.f32 %v546_v30  ;;  %vm105_vm15 = vmor %vm103_vm13, %vm104_vm10  ;;  %v154_v59 = vand.u32 2147483648, %v544_v29  ;;  %vm148_vm5 = vweird.f32 %v544_v29 }
  0x9c   :  { %v100_v35 = vsub.f32 1.0, %v99_v28  ;;  %vm118_vm7 = vweird.f32 %v546_v30  ;;  %vm153_vm8 = vcmp.eq.f32.partialorder %v152_v58, 8.507059e+37 }
  0x9d   :  { %v131_v36 = vmul.f32 %v382_v22, %v130_v31  ;;  %v155_v6 = vor.u32 1.1754944e-38, %v154_v59 }
  0x9e   :  { %v101_v38 = vmul.f32 %v384_v26, %v100_v35 }
  0x9f   :  { %v132_v40 = vadd.f32 %v382_v22, %v131_v36 }
  0xa0   :  { %v102_v42 = vadd.f32 %v384_v26, %v101_v38  ;;  %v386_v46 = vpop.eup %385 }
  0xa1   :  { %v136_v44 = vsel %vm135_vm12, %v382_v22, %v132_v40  ;;  %v388_v49 = vpop.eup %387  ;;  %v144_v52 = vmul.f32 %v386_v46, %v544_v29  ;;  %vm149_vm3 = vweird.f32 %v386_v46 }
  0xa2   :  { %v141_v47 = vsel %vm138_vm14, %v140_v41, %v136_v44  ;;  %v106_v48 = vsel %vm105_vm15, %v384_v26, %v102_v42  ;;  %v114_v54 = vmul.f32 %v388_v49, %v546_v30  ;;  %vm119_vm4 = vweird.f32 %v388_v49  ;;  %vm150_vm6 = vmor %vm148_vm5, %vm149_vm3 }
  0xa3   :  { %v142_v50 = vmul.f32 %v141_v47, %v441_v0  ;;  %v111_v51 = vsel %vm108_vm1, %v110_v45, %v106_v48  ;;  %v145_v56 = vsub.f32 1.0, %v144_v52  ;;  %v124_v0 = vand.u32 2147483648, %v546_v30  ;;  %vm120_vm9 = vmor %vm118_vm7, %vm119_vm4 }
  0xa4   :  { %v112_v53 = vmul.f32 %v111_v51, %v446_v1  ;;  %v115_v60 = vsub.f32 1.0, %v114_v54  ;;  %v122_v1 = vand.u32 2147483647, %v546_v30 }
  0xa5   :  { %v163_v55 = vmul.f32 %v372_v43, %v142_v50  ;;  %v146_v62 = vmul.f32 %v386_v46, %v145_v56  ;;  %v125_v9 = vor.u32 1.1754944e-38, %v124_v0 }
  0xa6   :  { %v161_v57 = vmul.f32 %v372_v43, %v112_v53  ;;  %v116_v2 = vmul.f32 %v388_v49, %v115_v60  ;;  %vm123_vm10 = vcmp.eq.f32.partialorder %v122_v1, 8.507059e+37 }
  0xa7   :  { %v167_v61 = vpack.c.bf16 %v163_v55, %v163_v55  ;;  %v147_v3 = vadd.f32 %v386_v46, %v146_v62 }
  0xa8   :  { %v165_v63 = vpack.c.bf16 %v161_v57, %v161_v57  ;;  %v117_v7 = vadd.f32 %v388_v49, %v116_v2 }
  0xa9   :  { %172 = vst.msk [vmem:[#allocation2 + $0x8] sm:$0xf] %vm169_vm2, %v167_v61  ;;  %v151_v8 = vsel %vm150_vm6, %v386_v46, %v147_v3 }
  0xaa   :  { %170 = vst.msk [vmem:[#allocation2] sm:$0xf] %vm169_vm2, %v165_v63  ;;  %v156_v10 = vsel %vm153_vm8, %v155_v6, %v151_v8  ;;  %v121_v11 = vsel %vm120_vm9, %v388_v49, %v117_v7 }
  0xab   :  { %v157_v12 = vmul.f32 %v156_v10, %v455_v4  ;;  %v126_v13 = vsel %vm123_vm10, %v125_v9, %v121_v11 }
  0xac   :  { %v127_v14 = vmul.f32 %v126_v13, %v460_v5 }
  0xad   :  { %v164_v15 = vmul.f32 %v372_v43, %v157_v12 }
  0xae   :  { %v162_v16 = vmul.f32 %v372_v43, %v127_v14 }
  0xaf   :  { %v168_v19 = vpack.c.bf16 %v164_v15, %v164_v15 }
  0xb0   :  { %v166_v20 = vpack.c.bf16 %v162_v16, %v162_v16 }
  0xb1   :  { %173 = vst.msk [vmem:[#allocation2 + $0xc] sm:$0xf] %vm169_vm2, %v168_v19 }
  0xb2   :  { %171 = vst.msk [vmem:[#allocation2 + $0x4] sm:$0xf] %vm169_vm2, %v166_v20 }
  0xb8   :  { %v352_v21 = vld [vmem:[#allocation2 + $0x8] sm:$0xff] }
  0xb9   :  { %v351_v22 = vld [vmem:[#allocation2] sm:$0xff]  ;;  %348 = vmatmul.msk.bf16.vlgmr.msra.gmra.mxu2 %vm28_vm0, %v352_v21  ;;  %350 = vmatmul.msk.bf16.vlgmr.msra.gmra.mxu3 %vm28_vm0, %v352_v21 }
  0xba   :  { %347 = vmatmul.msk.bf16.vlgmr.msra.gmra.mxu0 %vm28_vm0, %v351_v22  ;;  %349 = vmatmul.msk.bf16.vlgmr.msra.gmra.mxu1 %vm28_vm0, %v351_v22 }
 0x137   :  { %v252_v4 = vpop.f32.mrf.mxu0  ;;  %v271_v5 = vpop.f32.mrf.mxu1 }
 0x138   :  { %281 = vst [vmem:[#allocation3] sm:$0xff] %v252_v4 }
 0x139   :  { %282 = vst [vmem:[#allocation3 + $0x8] sm:$0xff] %v271_v5 }
 0x13c   :  { %v257_v23 = vpop.f32.mrf.mxu2  ;;  %v276_v17 = vpop.f32.mrf.mxu3 }
 0x13d   :  { %285 = vst [vmem:[#allocation3 + $0x20] sm:$0xff] %v257_v23 }
 0x13e   :  { %286 = vst [vmem:[#allocation3 + $0x28] sm:$0xff] %v276_v17 }
 0x13f   :  { %v254_v24 = vpop.f32.mrf.mxu0  ;;  %v273_v18 = vpop.f32.mrf.mxu1 }
 0x140   :  { %283 = vst [vmem:[#allocation3 + $0x10] sm:$0xff] %v254_v24 }
 0x141   :  { %284 = vst [vmem:[#allocation3 + $0x18] sm:$0xff] %v273_v18 }
 0x144   :  { %v259_v25 = vpop.f32.mrf.mxu2  ;;  %v278_v26 = vpop.f32.mrf.mxu3 }
 0x145   :  { %287 = vst [vmem:[#allocation3 + $0x30] sm:$0xff] %v259_v25 }
 0x146   :  { %288 = vst [vmem:[#allocation3 + $0x38] sm:$0xff] %v278_v26 }
 0x147   :  { %301 = dma.vmem_to_hbm [thread:$0]  %s294_s24, 1024, %s296_s27, [#allocation4], %s416_s28, %s416_s28, %s417_s29  }
 0x148   :  { %413 = dma.done.wait [#allocation4], 1024  }
 0x149   :  { %414 = vsyncadd [#allocation4], 4294966272 }
 0x14a   :  { %306 = vsyncpa [#allocation4], 1 }

</bundles_post_ra>
